<compile_context>
chip_gen: v6e
topology: v6e:2x2x1
jax: 0.10.0
libtpu: 0.0.40
codegen_flags: <defaults>
</compile_context>

<pallas_src>
import jax
import jax.numpy as jnp
from jax.experimental import pallas as pl
from jax.experimental.pallas import tpu as pltpu

# ---- module hyperparameters (synthetic, deterministic) ----------------------
T = 8            # args.timesteps
U = 32           # args.units
D_IN = T * 21    # 168  (fc1 contraction dim; kept un-padded, full-dim block)
H = T * U        # 256  hidden width (t*u)
D_OUT = 7
D_OUT_PAD = 128  # lane-dense padded output width


def _cdiv(a, b):
    return -(-a // b)


def _round_up(x, m):
    return _cdiv(x, m) * m


def _fold_bn(w, b, gamma, beta, mean, var, eps=1e-5):
    """Fold eval-mode BatchNorm1d into the preceding Linear (w: (in, out))."""
    s = gamma / jnp.sqrt(var + eps)                 # (out,)
    return w * s[None, :], s * (b - mean) + beta


def _choose_batch_tile(batch, block_b):
    """Rows per batch tile: close to block_b, minimal padding, and >=2 (even)
    tiles for larger batches so both v7x TensorCores get work."""
    n_tiles = max(1, _cdiv(batch, block_b))
    if batch >= 256:                 # enough rows for two TCs to matter
        n_tiles = max(n_tiles, 2)
        if n_tiles % 2:
            n_tiles += 1             # even tile count -> balanced 2-TC split
    return _round_up(_cdiv(batch, n_tiles), 8)


# ---- kernel ------------------------------------------------------------------
def _linear_net3b_kernel(x_ref, w1_ref, b1_ref, w2_ref, b2_ref,
                         w3_ref, b3_ref, w4_ref, b4_ref, o_ref, h_ref):
    """One batch tile: 4 matmuls (bf16 operands, f32 accum) + bias + ReLU.

    Inter-layer activations are staged through the bf16 VMEM scratch `h_ref`
    so the inevitably-spilled (TM, 256) intermediates move half the bytes.
    """
    # fc1 (+ folded bn1) + act; drop1 = identity (eval).  K=168, un-padded.
    x = x_ref[...].astype(jnp.bfloat16)                               # (TM, 168)
    h = jnp.dot(x, w1_ref[...], preferred_element_type=jnp.float32)   # (TM, H) f32
    h_ref[...] = jnp.maximum(h + b1_ref[...], 0.0).astype(jnp.bfloat16)

    # fc2 (+ folded bn2) + act; drop2 = identity (eval)
    h = jnp.dot(h_ref[...], w2_ref[...], preferred_element_type=jnp.float32)
    h_ref[...] = jnp.maximum(h + b2_ref[...], 0.0).astype(jnp.bfloat16)

    # fc3 (+ folded bn3) + act; drop3 = identity (eval)
    h = jnp.dot(h_ref[...], w3_ref[...], preferred_element_type=jnp.float32)
    h_ref[...] = jnp.maximum(h + b3_ref[...], 0.0).astype(jnp.bfloat16)

    # fc4 (output lanes zero-padded 7 -> 128 => unmasked, lane-dense bf16 store)
    y = jnp.dot(h_ref[...], w4_ref[...], preferred_element_type=jnp.float32)
    o_ref[...] = (y + b4_ref[...]).astype(o_ref.dtype)


# ---- wrapper -----------------------------------------------------------------
def linear_net3b_forward(x, p, *, block_b=2048):
    """x: (B, t, 21) float32 -> (B, 7) float32 (eval-mode forward)."""
    B = x.shape[0]
    x2d = x.reshape(B, D_IN).astype(jnp.float32)    # == x.view(-1, t*21); no copy

    # ---- fold eval-mode BN into fc1..fc3 (exact in eval mode) ----------------
    w1f, b1f = _fold_bn(p["w1"], p["b1"], p["g1"], p["be1"], p["m1"], p["v1"])
    w2f, b2f = _fold_bn(p["w2"], p["b2"], p["g2"], p["be2"], p["m2"], p["v2"])
    w3f, b3f = _fold_bn(p["w3"], p["b3"], p["g3"], p["be3"], p["m3"], p["v3"])

    # ---- pad only fc4's output lanes (7 -> 128, one-time, tiny) --------------
    w4p = jnp.zeros((H, D_OUT_PAD), jnp.float32).at[:, :D_OUT].set(p["w4"])
    b4p = jnp.zeros((1, D_OUT_PAD), jnp.float32).at[:, :D_OUT].set(
        p["b4"].reshape(1, D_OUT))

    operands = (
        x2d,                                        # f32, cast to bf16 in-kernel
        w1f.astype(jnp.bfloat16), b1f.reshape(1, H),
        w2f.astype(jnp.bfloat16), b2f.reshape(1, H),
        w3f.astype(jnp.bfloat16), b3f.reshape(1, H),
        w4p.astype(jnp.bfloat16), b4p,
    )

    tm = _choose_batch_tile(B, block_b)
    grid = (_cdiv(B, tm),)          # partial last block handled by Pallas

    def run(single_buffer_weights):
        def wspec(shape):
            # Grid-invariant operands: request single buffering to free VMEM.
            if single_buffer_weights:
                return pl.BlockSpec(shape, lambda i: (0, 0),
                                    pipeline_mode=pl.Buffered(1))
            return pl.BlockSpec(shape, lambda i: (0, 0))

        return pl.pallas_call(
            _linear_net3b_kernel,
            out_shape=jax.ShapeDtypeStruct((B, D_OUT_PAD), jnp.bfloat16),
            grid=grid,
            in_specs=[
                pl.BlockSpec((tm, D_IN), lambda i: (i, 0)),    # x tile (f32, K=168)
                wspec((D_IN, H)), wspec((1, H)),               # w1, b1 (resident)
                wspec((H, H)), wspec((1, H)),                  # w2, b2
                wspec((H, H)), wspec((1, H)),                  # w3, b3
                wspec((H, D_OUT_PAD)), wspec((1, D_OUT_PAD)),  # w4, b4 (padded N)
            ],
            out_specs=pl.BlockSpec((tm, D_OUT_PAD), lambda i: (i, 0)),
            scratch_shapes=[pltpu.VMEM((tm, H), jnp.bfloat16)],  # bf16 activation stage
            compiler_params=pltpu.CompilerParams(
                dimension_semantics=("parallel",),   # batch tiles independent (v7x 2-TC)
            ),
        )(*operands)

    try:
        out = jax.block_until_ready(run(single_buffer_weights=True))
    except Exception:
        # Installed Pallas rejects BlockSpec(pipeline_mode=...); fall back to
        # default double-buffered resident weights (semantics identical).
        out = run(single_buffer_weights=False)

    return out[:, :D_OUT].astype(jnp.float32)


# ---- references --------------------------------------------------------------
def _reference_tight(x2d, p):
    """Mirrors the kernel math exactly: folded BN, bf16 operands, f32 accum,
    bf16 intermediate/final rounding."""
    bf = lambda a: a.astype(jnp.bfloat16)
    w1f, b1f = _fold_bn(p["w1"], p["b1"], p["g1"], p["be1"], p["m1"], p["v1"])
    w2f, b2f = _fold_bn(p["w2"], p["b2"], p["g2"], p["be2"], p["m2"], p["v2"])
    w3f, b3f = _fold_bn(p["w3"], p["b3"], p["g3"], p["be3"], p["m3"], p["v3"])
    h = bf(jnp.maximum(jnp.dot(bf(x2d), bf(w1f),
                               preferred_element_type=jnp.float32) + b1f, 0.0))
    h = bf(jnp.maximum(jnp.dot(h, bf(w2f),
                               preferred_element_type=jnp.float32) + b2f, 0.0))
    h = bf(jnp.maximum(jnp.dot(h, bf(w3f),
                               preferred_element_type=jnp.float32) + b3f, 0.0))
    y = jnp.dot(h, bf(p["w4"]), preferred_element_type=jnp.float32) + p["b4"]
    return y.astype(jnp.bfloat16).astype(jnp.float32)


def _reference_module(x2d, p):
    """Original module math in f32 with explicit eval-mode BatchNorm."""
    def bn_eval(v, g, be, m, var, eps=1e-5):
        return (v - m) / jnp.sqrt(var + eps) * g + be
    h = jnp.maximum(bn_eval(x2d @ p["w1"] + p["b1"],
                            p["g1"], p["be1"], p["m1"], p["v1"]), 0.0)
    h = jnp.maximum(bn_eval(h @ p["w2"] + p["b2"],
                            p["g2"], p["be2"], p["m2"], p["v2"]), 0.0)
    h = jnp.maximum(bn_eval(h @ p["w3"] + p["b3"],
                            p["g3"], p["be3"], p["m3"], p["v3"]), 0.0)
    return h @ p["w4"] + p["b4"]


def init_params(key):
    """Deterministic params matching nn.Linear / nn.BatchNorm1d shapes.

    Linear weights are stored transposed as (in_features, out_features) so the
    kernel computes y = x @ W + b (== PyTorch x @ W.T + b).
    BN running stats are synthetic but benign (var ~ U(0.5, 1.5)).
    """
    ks = jax.random.split(key, 20)

    def linear(kw, kb, fan_in, fan_out):
        bound = 1.0 / jnp.sqrt(jnp.float32(fan_in))
        w = jax.random.uniform(kw, (fan_in, fan_out), jnp.float32, -bound, bound)
        b = jax.random.uniform(kb, (fan_out,), jnp.float32, -bound, bound)
        return w, b

    def bn(kg, kb, km, kv, n):
        gamma = jax.random.uniform(kg, (n,), jnp.float32, 0.8, 1.2)
        beta = 0.1 * jax.random.normal(kb, (n,), jnp.float32)
        mean = 0.1 * jax.random.normal(km, (n,), jnp.float32)
        var = jax.random.uniform(kv, (n,), jnp.float32, 0.5, 1.5)
        return gamma, beta, mean, var

    p = {}
    p["w1"], p["b1"] = linear(ks[0], ks[1], D_IN, H)
    p["g1"], p["be1"], p["m1"], p["v1"] = bn(ks[2], ks[3], ks[4], ks[5], H)
    p["w2"], p["b2"] = linear(ks[6], ks[7], H, H)
    p["g2"], p["be2"], p["m2"], p["v2"] = bn(ks[8], ks[9], ks[10], ks[11], H)
    p["w3"], p["b3"] = linear(ks[12], ks[13], H, H)
    p["g3"], p["be3"], p["m3"], p["v3"] = bn(ks[14], ks[15], ks[16], ks[17], H)
    p["w4"], p["b4"] = linear(ks[18], ks[19], H, D_OUT)
    return p


if __name__ == "__main__":
    key = jax.random.PRNGKey(0)
    k_x, k_p = jax.random.split(key)
    p = init_params(k_p)

    # B=2: tiny sanity batch (single tile, partial block).
    # B=300: exercises the multi-tile parallel grid + partial last block.
    for B in (2, 300):
        x = jax.random.normal(jax.random.fold_in(k_x, B), (B, T, 21), jnp.float32)
        out = jax.block_until_ready(linear_net3b_forward(x, p))
        assert out.shape == (B, D_OUT), out.shape

        x2d = x.reshape(B, D_IN)
        ref_tight = _reference_tight(x2d, p)
        assert jnp.allclose(out, ref_tight, atol=1e-2, rtol=1e-2), (
            f"mismatch vs bf16 reference at B={B}")
        ref_module = _reference_module(x2d, p)
        assert jnp.allclose(out, ref_module, atol=5e-2, rtol=5e-2), (
            f"mismatch vs module reference at B={B}")

    print("KERNEL_OK")
</pallas_src>

<mosaic_0001>
module attributes {stable_mosaic.version = 11 : i64} {
  func.func @_linear_net3b_kernel(%arg0: i32, %arg1: memref<8x168xf32, #tpu.memory_space<vmem>>, %arg2: memref<168x256xbf16, #tpu.memory_space<vmem>>, %arg3: memref<1x256xf32, #tpu.memory_space<vmem>>, %arg4: memref<256x256xbf16, #tpu.memory_space<vmem>>, %arg5: memref<1x256xf32, #tpu.memory_space<vmem>>, %arg6: memref<256x256xbf16, #tpu.memory_space<vmem>>, %arg7: memref<1x256xf32, #tpu.memory_space<vmem>>, %arg8: memref<256x128xbf16, #tpu.memory_space<vmem>>, %arg9: memref<1x128xf32, #tpu.memory_space<vmem>>, %arg10: memref<8x128xbf16, #tpu.memory_space<vmem>>, %arg11: memref<8x256xbf16, #tpu.memory_space<vmem>>) attributes {dimension_semantics = [#tpu.dimension_semantics<parallel>], iteration_bounds = array<i64: 1>, scalar_prefetch = 0 : i64, scratch_operands = 1 : i64, tpu.core_type = #tpu.core_type<tc>, window_params = [{transform_indices = @transform_0, window_bounds = array<i64: 8, 168>}, {pipeline_mode = #tpu.pipeline_mode<synchronous>, transform_indices = @transform_1, window_bounds = array<i64: 168, 256>}, {pipeline_mode = #tpu.pipeline_mode<synchronous>, transform_indices = @transform_2, window_bounds = array<i64: 1, 256>}, {pipeline_mode = #tpu.pipeline_mode<synchronous>, transform_indices = @transform_3, window_bounds = array<i64: 256, 256>}, {pipeline_mode = #tpu.pipeline_mode<synchronous>, transform_indices = @transform_4, window_bounds = array<i64: 1, 256>}, {pipeline_mode = #tpu.pipeline_mode<synchronous>, transform_indices = @transform_5, window_bounds = array<i64: 256, 256>}, {pipeline_mode = #tpu.pipeline_mode<synchronous>, transform_indices = @transform_6, window_bounds = array<i64: 1, 256>}, {pipeline_mode = #tpu.pipeline_mode<synchronous>, transform_indices = @transform_7, window_bounds = array<i64: 256, 128>}, {pipeline_mode = #tpu.pipeline_mode<synchronous>, transform_indices = @transform_8, window_bounds = array<i64: 1, 128>}, {transform_indices = @transform_9, window_bounds = array<i64: 8, 128>}]} {
    %c0 = arith.constant 0 : index
    %c0_0 = arith.constant 0 : index
    %0 = vector.load %arg1[%c0, %c0_0] : memref<8x168xf32, #tpu.memory_space<vmem>>, vector<8x168xf32>
    %1 = arith.truncf %0 : vector<8x168xf32> to vector<8x168xbf16>
    %c0_1 = arith.constant 0 : index
    %c0_2 = arith.constant 0 : index
    %2 = vector.load %arg2[%c0_1, %c0_2] : memref<168x256xbf16, #tpu.memory_space<vmem>>, vector<168x256xbf16>
    %cst = arith.constant dense<0.000000e+00> : vector<8x256xf32>
    %3 = tpu.matmul %1, %2, %cst {dimension_numbers = #tpu.dot_dimension_numbers<[1], [0], [0], [1], [0, 0, 1, 1], [], []>} : vector<8x168xbf16>, vector<168x256xbf16>, vector<8x256xf32> -> vector<8x256xf32>
    %c0_3 = arith.constant 0 : index
    %c0_4 = arith.constant 0 : index
    %4 = vector.load %arg3[%c0_3, %c0_4] : memref<1x256xf32, #tpu.memory_space<vmem>>, vector<1x256xf32>
    %5 = vector.broadcast %4 : vector<1x256xf32> to vector<8x256xf32>
    %6 = arith.addf %3, %5 : vector<8x256xf32>
    %cst_5 = arith.constant 0.000000e+00 : f32
    %7 = vector.broadcast %cst_5 : f32 to vector<8x256xf32>
    %8 = arith.maximumf %6, %7 : vector<8x256xf32>
    %9 = arith.truncf %8 : vector<8x256xf32> to vector<8x256xbf16>
    %c0_6 = arith.constant 0 : index
    %c0_7 = arith.constant 0 : index
    %10 = vector.load %arg11[%c0_6, %c0_7] : memref<8x256xbf16, #tpu.memory_space<vmem>>, vector<8x256xbf16>
    tpu.vector_store %arg11[%c0_6, %c0_7], %9 {strides = array<i32>} : memref<8x256xbf16, #tpu.memory_space<vmem>>, vector<8x256xbf16>,
    %c0_8 = arith.constant 0 : index
    %c0_9 = arith.constant 0 : index
    %11 = vector.load %arg11[%c0_8, %c0_9] : memref<8x256xbf16, #tpu.memory_space<vmem>>, vector<8x256xbf16>
    %c0_10 = arith.constant 0 : index
    %c0_11 = arith.constant 0 : index
    %12 = vector.load %arg4[%c0_10, %c0_11] : memref<256x256xbf16, #tpu.memory_space<vmem>>, vector<256x256xbf16>
    %cst_12 = arith.constant dense<0.000000e+00> : vector<8x256xf32>
    %13 = tpu.matmul %11, %12, %cst_12 {dimension_numbers = #tpu.dot_dimension_numbers<[1], [0], [0], [1], [0, 0, 1, 1], [], []>} : vector<8x256xbf16>, vector<256x256xbf16>, vector<8x256xf32> -> vector<8x256xf32>
    %c0_13 = arith.constant 0 : index
    %c0_14 = arith.constant 0 : index
    %14 = vector.load %arg5[%c0_13, %c0_14] : memref<1x256xf32, #tpu.memory_space<vmem>>, vector<1x256xf32>
    %15 = vector.broadcast %14 : vector<1x256xf32> to vector<8x256xf32>
    %16 = arith.addf %13, %15 : vector<8x256xf32>
    %cst_15 = arith.constant 0.000000e+00 : f32
    %17 = vector.broadcast %cst_15 : f32 to vector<8x256xf32>
    %18 = arith.maximumf %16, %17 : vector<8x256xf32>
    %19 = arith.truncf %18 : vector<8x256xf32> to vector<8x256xbf16>
    %c0_16 = arith.constant 0 : index
    %c0_17 = arith.constant 0 : index
    %20 = vector.load %arg11[%c0_16, %c0_17] : memref<8x256xbf16, #tpu.memory_space<vmem>>, vector<8x256xbf16>
    tpu.vector_store %arg11[%c0_16, %c0_17], %19 {strides = array<i32>} : memref<8x256xbf16, #tpu.memory_space<vmem>>, vector<8x256xbf16>,
    %c0_18 = arith.constant 0 : index
    %c0_19 = arith.constant 0 : index
    %21 = vector.load %arg11[%c0_18, %c0_19] : memref<8x256xbf16, #tpu.memory_space<vmem>>, vector<8x256xbf16>
    %c0_20 = arith.constant 0 : index
    %c0_21 = arith.constant 0 : index
    %22 = vector.load %arg6[%c0_20, %c0_21] : memref<256x256xbf16, #tpu.memory_space<vmem>>, vector<256x256xbf16>
    %cst_22 = arith.constant dense<0.000000e+00> : vector<8x256xf32>
    %23 = tpu.matmul %21, %22, %cst_22 {dimension_numbers = #tpu.dot_dimension_numbers<[1], [0], [0], [1], [0, 0, 1, 1], [], []>} : vector<8x256xbf16>, vector<256x256xbf16>, vector<8x256xf32> -> vector<8x256xf32>
    %c0_23 = arith.constant 0 : index
    %c0_24 = arith.constant 0 : index
    %24 = vector.load %arg7[%c0_23, %c0_24] : memref<1x256xf32, #tpu.memory_space<vmem>>, vector<1x256xf32>
    %25 = vector.broadcast %24 : vector<1x256xf32> to vector<8x256xf32>
    %26 = arith.addf %23, %25 : vector<8x256xf32>
    %cst_25 = arith.constant 0.000000e+00 : f32
    %27 = vector.broadcast %cst_25 : f32 to vector<8x256xf32>
    %28 = arith.maximumf %26, %27 : vector<8x256xf32>
    %29 = arith.truncf %28 : vector<8x256xf32> to vector<8x256xbf16>
    %c0_26 = arith.constant 0 : index
    %c0_27 = arith.constant 0 : index
    %30 = vector.load %arg11[%c0_26, %c0_27] : memref<8x256xbf16, #tpu.memory_space<vmem>>, vector<8x256xbf16>
    tpu.vector_store %arg11[%c0_26, %c0_27], %29 {strides = array<i32>} : memref<8x256xbf16, #tpu.memory_space<vmem>>, vector<8x256xbf16>,
    %c0_28 = arith.constant 0 : index
    %c0_29 = arith.constant 0 : index
    %31 = vector.load %arg11[%c0_28, %c0_29] : memref<8x256xbf16, #tpu.memory_space<vmem>>, vector<8x256xbf16>
    %c0_30 = arith.constant 0 : index
    %c0_31 = arith.constant 0 : index
    %32 = vector.load %arg8[%c0_30, %c0_31] : memref<256x128xbf16, #tpu.memory_space<vmem>>, vector<256x128xbf16>
    %cst_32 = arith.constant dense<0.000000e+00> : vector<8x128xf32>
    %33 = tpu.matmul %31, %32, %cst_32 {dimension_numbers = #tpu.dot_dimension_numbers<[1], [0], [0], [1], [0, 0, 1, 1], [], []>} : vector<8x256xbf16>, vector<256x128xbf16>, vector<8x128xf32> -> vector<8x128xf32>
    %c0_33 = arith.constant 0 : index
    %c0_34 = arith.constant 0 : index
    %34 = vector.load %arg9[%c0_33, %c0_34] : memref<1x128xf32, #tpu.memory_space<vmem>>, vector<1x128xf32>
    %35 = vector.broadcast %34 : vector<1x128xf32> to vector<8x128xf32>
    %36 = arith.addf %33, %35 : vector<8x128xf32>
    %37 = arith.truncf %36 : vector<8x128xf32> to vector<8x128xbf16>
    %c0_35 = arith.constant 0 : index
    %c0_36 = arith.constant 0 : index
    %38 = vector.load %arg10[%c0_35, %c0_36] : memref<8x128xbf16, #tpu.memory_space<vmem>>, vector<8x128xbf16>
    tpu.vector_store %arg10[%c0_35, %c0_36], %37 {strides = array<i32>} : memref<8x128xbf16, #tpu.memory_space<vmem>>, vector<8x128xbf16>,
    return
  }
  func.func @transform_0(%arg0: i32) -> (i32, i32) {
    %c0_i32 = arith.constant 0 : i32
    %c0_i32_0 = arith.constant 0 : i32
    return %arg0, %c0_i32 : i32, i32
  }
  func.func @transform_1(%arg0: i32) -> (i32, i32) {
    %c0_i32 = arith.constant 0 : i32
    %c0_i32_0 = arith.constant 0 : i32
    %c0_i32_1 = arith.constant 0 : i32
    return %c0_i32, %c0_i32_0 : i32, i32
  }
  func.func @transform_2(%arg0: i32) -> (i32, i32) {
    %c0_i32 = arith.constant 0 : i32
    %c0_i32_0 = arith.constant 0 : i32
    %c0_i32_1 = arith.constant 0 : i32
    return %c0_i32, %c0_i32_0 : i32, i32
  }
  func.func @transform_3(%arg0: i32) -> (i32, i32) {
    %c0_i32 = arith.constant 0 : i32
    %c0_i32_0 = arith.constant 0 : i32
    %c0_i32_1 = arith.constant 0 : i32
    return %c0_i32, %c0_i32_0 : i32, i32
  }
  func.func @transform_4(%arg0: i32) -> (i32, i32) {
    %c0_i32 = arith.constant 0 : i32
    %c0_i32_0 = arith.constant 0 : i32
    %c0_i32_1 = arith.constant 0 : i32
    return %c0_i32, %c0_i32_0 : i32, i32
  }
  func.func @transform_5(%arg0: i32) -> (i32, i32) {
    %c0_i32 = arith.constant 0 : i32
    %c0_i32_0 = arith.constant 0 : i32
    %c0_i32_1 = arith.constant 0 : i32
    return %c0_i32, %c0_i32_0 : i32, i32
  }
  func.func @transform_6(%arg0: i32) -> (i32, i32) {
    %c0_i32 = arith.constant 0 : i32
    %c0_i32_0 = arith.constant 0 : i32
    %c0_i32_1 = arith.constant 0 : i32
    return %c0_i32, %c0_i32_0 : i32, i32
  }
  func.func @transform_7(%arg0: i32) -> (i32, i32) {
    %c0_i32 = arith.constant 0 : i32
    %c0_i32_0 = arith.constant 0 : i32
    %c0_i32_1 = arith.constant 0 : i32
    return %c0_i32, %c0_i32_0 : i32, i32
  }
  func.func @transform_8(%arg0: i32) -> (i32, i32) {
    %c0_i32 = arith.constant 0 : i32
    %c0_i32_0 = arith.constant 0 : i32
    %c0_i32_1 = arith.constant 0 : i32
    return %c0_i32, %c0_i32_0 : i32, i32
  }
  func.func @transform_9(%arg0: i32) -> (i32, i32) {
    %c0_i32 = arith.constant 0 : i32
    %c0_i32_0 = arith.constant 0 : i32
    return %arg0, %c0_i32 : i32, i32
  }
}

module attributes {stable_mosaic.version = 11 : i64} {
  func.func @_linear_net3b_kernel(%arg0: i32, %arg1: memref<8x168xf32, #tpu.memory_space<vmem>>, %arg2: memref<168x256xbf16, #tpu.memory_space<vmem>>, %arg3: memref<1x256xf32, #tpu.memory_space<vmem>>, %arg4: memref<256x256xbf16, #tpu.memory_space<vmem>>, %arg5: memref<1x256xf32, #tpu.memory_space<vmem>>, %arg6: memref<256x256xbf16, #tpu.memory_space<vmem>>, %arg7: memref<1x256xf32, #tpu.memory_space<vmem>>, %arg8: memref<256x128xbf16, #tpu.memory_space<vmem>>, %arg9: memref<1x128xf32, #tpu.memory_space<vmem>>, %arg10: memref<8x128xbf16, #tpu.memory_space<vmem>>, %arg11: memref<8x256xbf16, #tpu.memory_space<vmem>>) attributes {dimension_semantics = [#tpu.dimension_semantics<parallel>], iteration_bounds = array<i64: 1>, scalar_prefetch = 0 : i64, scratch_operands = 1 : i64, tpu.core_type = #tpu.core_type<tc>, window_params = [{transform_indices = @transform_0, window_bounds = array<i64: 8, 168>}, {pipeline_mode = #tpu.pipeline_mode<synchronous>, transform_indices = @transform_1, window_bounds = array<i64: 168, 256>}, {pipeline_mode = #tpu.pipeline_mode<synchronous>, transform_indices = @transform_2, window_bounds = array<i64: 1, 256>}, {pipeline_mode = #tpu.pipeline_mode<synchronous>, transform_indices = @transform_3, window_bounds = array<i64: 256, 256>}, {pipeline_mode = #tpu.pipeline_mode<synchronous>, transform_indices = @transform_4, window_bounds = array<i64: 1, 256>}, {pipeline_mode = #tpu.pipeline_mode<synchronous>, transform_indices = @transform_5, window_bounds = array<i64: 256, 256>}, {pipeline_mode = #tpu.pipeline_mode<synchronous>, transform_indices = @transform_6, window_bounds = array<i64: 1, 256>}, {pipeline_mode = #tpu.pipeline_mode<synchronous>, transform_indices = @transform_7, window_bounds = array<i64: 256, 128>}, {pipeline_mode = #tpu.pipeline_mode<synchronous>, transform_indices = @transform_8, window_bounds = array<i64: 1, 128>}, {transform_indices = @transform_9, window_bounds = array<i64: 8, 128>}]} {
    %c0 = arith.constant 0 : index
    %c0_0 = arith.constant 0 : index
    %0 = vector.load %arg1[%c0, %c0_0] : memref<8x168xf32, #tpu.memory_space<vmem>>, vector<8x168xf32>
    %1 = arith.truncf %0 : vector<8x168xf32> to vector<8x168xbf16>
    %c0_1 = arith.constant 0 : index
    %c0_2 = arith.constant 0 : index
    %2 = vector.load %arg2[%c0_1, %c0_2] : memref<168x256xbf16, #tpu.memory_space<vmem>>, vector<168x256xbf16>
    %cst = arith.constant dense<0.000000e+00> : vector<8x256xf32>
    %3 = tpu.matmul %1, %2, %cst {dimension_numbers = #tpu.dot_dimension_numbers<[1], [0], [0], [1], [0, 0, 1, 1], [], []>} : vector<8x168xbf16>, vector<168x256xbf16>, vector<8x256xf32> -> vector<8x256xf32>
    %c0_3 = arith.constant 0 : index
    %c0_4 = arith.constant 0 : index
    %4 = vector.load %arg3[%c0_3, %c0_4] : memref<1x256xf32, #tpu.memory_space<vmem>>, vector<1x256xf32>
    %5 = vector.broadcast %4 : vector<1x256xf32> to vector<8x256xf32>
    %6 = arith.addf %3, %5 : vector<8x256xf32>
    %cst_5 = arith.constant 0.000000e+00 : f32
    %7 = vector.broadcast %cst_5 : f32 to vector<8x256xf32>
    %8 = arith.maximumf %6, %7 : vector<8x256xf32>
    %9 = arith.truncf %8 : vector<8x256xf32> to vector<8x256xbf16>
    %c0_6 = arith.constant 0 : index
    %c0_7 = arith.constant 0 : index
    %10 = vector.load %arg11[%c0_6, %c0_7] : memref<8x256xbf16, #tpu.memory_space<vmem>>, vector<8x256xbf16>
    tpu.vector_store %arg11[%c0_6, %c0_7], %9 {strides = array<i32>} : memref<8x256xbf16, #tpu.memory_space<vmem>>, vector<8x256xbf16>,
    %c0_8 = arith.constant 0 : index
    %c0_9 = arith.constant 0 : index
    %11 = vector.load %arg11[%c0_8, %c0_9] : memref<8x256xbf16, #tpu.memory_space<vmem>>, vector<8x256xbf16>
    %c0_10 = arith.constant 0 : index
    %c0_11 = arith.constant 0 : index
    %12 = vector.load %arg4[%c0_10, %c0_11] : memref<256x256xbf16, #tpu.memory_space<vmem>>, vector<256x256xbf16>
    %cst_12 = arith.constant dense<0.000000e+00> : vector<8x256xf32>
    %13 = tpu.matmul %11, %12, %cst_12 {dimension_numbers = #tpu.dot_dimension_numbers<[1], [0], [0], [1], [0, 0, 1, 1], [], []>} : vector<8x256xbf16>, vector<256x256xbf16>, vector<8x256xf32> -> vector<8x256xf32>
    %c0_13 = arith.constant 0 : index
    %c0_14 = arith.constant 0 : index
    %14 = vector.load %arg5[%c0_13, %c0_14] : memref<1x256xf32, #tpu.memory_space<vmem>>, vector<1x256xf32>
    %15 = vector.broadcast %14 : vector<1x256xf32> to vector<8x256xf32>
    %16 = arith.addf %13, %15 : vector<8x256xf32>
    %cst_15 = arith.constant 0.000000e+00 : f32
    %17 = vector.broadcast %cst_15 : f32 to vector<8x256xf32>
    %18 = arith.maximumf %16, %17 : vector<8x256xf32>
    %19 = arith.truncf %18 : vector<8x256xf32> to vector<8x256xbf16>
    %c0_16 = arith.constant 0 : index
    %c0_17 = arith.constant 0 : index
    %20 = vector.load %arg11[%c0_16, %c0_17] : memref<8x256xbf16, #tpu.memory_space<vmem>>, vector<8x256xbf16>
    tpu.vector_store %arg11[%c0_16, %c0_17], %19 {strides = array<i32>} : memref<8x256xbf16, #tpu.memory_space<vmem>>, vector<8x256xbf16>,
    %c0_18 = arith.constant 0 : index
    %c0_19 = arith.constant 0 : index
    %21 = vector.load %arg11[%c0_18, %c0_19] : memref<8x256xbf16, #tpu.memory_space<vmem>>, vector<8x256xbf16>
    %c0_20 = arith.constant 0 : index
    %c0_21 = arith.constant 0 : index
    %22 = vector.load %arg6[%c0_20, %c0_21] : memref<256x256xbf16, #tpu.memory_space<vmem>>, vector<256x256xbf16>
    %cst_22 = arith.constant dense<0.000000e+00> : vector<8x256xf32>
    %23 = tpu.matmul %21, %22, %cst_22 {dimension_numbers = #tpu.dot_dimension_numbers<[1], [0], [0], [1], [0, 0, 1, 1], [], []>} : vector<8x256xbf16>, vector<256x256xbf16>, vector<8x256xf32> -> vector<8x256xf32>
    %c0_23 = arith.constant 0 : index
    %c0_24 = arith.constant 0 : index
    %24 = vector.load %arg7[%c0_23, %c0_24] : memref<1x256xf32, #tpu.memory_space<vmem>>, vector<1x256xf32>
    %25 = vector.broadcast %24 : vector<1x256xf32> to vector<8x256xf32>
    %26 = arith.addf %23, %25 : vector<8x256xf32>
    %cst_25 = arith.constant 0.000000e+00 : f32
    %27 = vector.broadcast %cst_25 : f32 to vector<8x256xf32>
    %28 = arith.maximumf %26, %27 : vector<8x256xf32>
    %29 = arith.truncf %28 : vector<8x256xf32> to vector<8x256xbf16>
    %c0_26 = arith.constant 0 : index
    %c0_27 = arith.constant 0 : index
    %30 = vector.load %arg11[%c0_26, %c0_27] : memref<8x256xbf16, #tpu.memory_space<vmem>>, vector<8x256xbf16>
    tpu.vector_store %arg11[%c0_26, %c0_27], %29 {strides = array<i32>} : memref<8x256xbf16, #tpu.memory_space<vmem>>, vector<8x256xbf16>,
    %c0_28 = arith.constant 0 : index
    %c0_29 = arith.constant 0 : index
    %31 = vector.load %arg11[%c0_28, %c0_29] : memref<8x256xbf16, #tpu.memory_space<vmem>>, vector<8x256xbf16>
    %c0_30 = arith.constant 0 : index
    %c0_31 = arith.constant 0 : index
    %32 = vector.load %arg8[%c0_30, %c0_31] : memref<256x128xbf16, #tpu.memory_space<vmem>>, vector<256x128xbf16>
    %cst_32 = arith.constant dense<0.000000e+00> : vector<8x128xf32>
    %33 = tpu.matmul %31, %32, %cst_32 {dimension_numbers = #tpu.dot_dimension_numbers<[1], [0], [0], [1], [0, 0, 1, 1], [], []>} : vector<8x256xbf16>, vector<256x128xbf16>, vector<8x128xf32> -> vector<8x128xf32>
    %c0_33 = arith.constant 0 : index
    %c0_34 = arith.constant 0 : index
    %34 = vector.load %arg9[%c0_33, %c0_34] : memref<1x128xf32, #tpu.memory_space<vmem>>, vector<1x128xf32>
    %35 = vector.broadcast %34 : vector<1x128xf32> to vector<8x128xf32>
    %36 = arith.addf %33, %35 : vector<8x128xf32>
    %37 = arith.truncf %36 : vector<8x128xf32> to vector<8x128xbf16>
    %c0_35 = arith.constant 0 : index
    %c0_36 = arith.constant 0 : index
    %38 = vector.load %arg10[%c0_35, %c0_36] : memref<8x128xbf16, #tpu.memory_space<vmem>>, vector<8x128xbf16>
    tpu.vector_store %arg10[%c0_35, %c0_36], %37 {strides = array<i32>} : memref<8x128xbf16, #tpu.memory_space<vmem>>, vector<8x128xbf16>,
    return
  }
  func.func @transform_0(%arg0: i32) -> (i32, i32) {
    %c0_i32 = arith.constant 0 : i32
    %c0_i32_0 = arith.constant 0 : i32
    return %arg0, %c0_i32 : i32, i32
  }
  func.func @transform_1(%arg0: i32) -> (i32, i32) {
    %c0_i32 = arith.constant 0 : i32
    %c0_i32_0 = arith.constant 0 : i32
    %c0_i32_1 = arith.constant 0 : i32
    return %c0_i32, %c0_i32_0 : i32, i32
  }
  func.func @transform_2(%arg0: i32) -> (i32, i32) {
    %c0_i32 = arith.constant 0 : i32
    %c0_i32_0 = arith.constant 0 : i32
    %c0_i32_1 = arith.constant 0 : i32
    return %c0_i32, %c0_i32_0 : i32, i32
  }
  func.func @transform_3(%arg0: i32) -> (i32, i32) {
    %c0_i32 = arith.constant 0 : i32
    %c0_i32_0 = arith.constant 0 : i32
    %c0_i32_1 = arith.constant 0 : i32
    return %c0_i32, %c0_i32_0 : i32, i32
  }
  func.func @transform_4(%arg0: i32) -> (i32, i32) {
    %c0_i32 = arith.constant 0 : i32
    %c0_i32_0 = arith.constant 0 : i32
    %c0_i32_1 = arith.constant 0 : i32
    return %c0_i32, %c0_i32_0 : i32, i32
  }
  func.func @transform_5(%arg0: i32) -> (i32, i32) {
    %c0_i32 = arith.constant 0 : i32
    %c0_i32_0 = arith.constant 0 : i32
    %c0_i32_1 = arith.constant 0 : i32
    return %c0_i32, %c0_i32_0 : i32, i32
  }
  func.func @transform_6(%arg0: i32) -> (i32, i32) {
    %c0_i32 = arith.constant 0 : i32
    %c0_i32_0 = arith.constant 0 : i32
    %c0_i32_1 = arith.constant 0 : i32
    return %c0_i32, %c0_i32_0 : i32, i32
  }
  func.func @transform_7(%arg0: i32) -> (i32, i32) {
    %c0_i32 = arith.constant 0 : i32
    %c0_i32_0 = arith.constant 0 : i32
    %c0_i32_1 = arith.constant 0 : i32
    return %c0_i32, %c0_i32_0 : i32, i32
  }
  func.func @transform_8(%arg0: i32) -> (i32, i32) {
    %c0_i32 = arith.constant 0 : i32
    %c0_i32_0 = arith.constant 0 : i32
    %c0_i32_1 = arith.constant 0 : i32
    return %c0_i32, %c0_i32_0 : i32, i32
  }
  func.func @transform_9(%arg0: i32) -> (i32, i32) {
    %c0_i32 = arith.constant 0 : i32
    %c0_i32_0 = arith.constant 0 : i32
    return %arg0, %c0_i32 : i32, i32
  }
}

</mosaic_0001>

<bundles_post_ra>
// kernel: tpu_custom_call.1
= control target key start
LH: loop header
LB: loop body
LE: loop exit
PB: predicated region body
PF: predicated region fallthrough
CT: control target
= control target key end

     0   :  { %14 = vsyncpa [#allocation4], 0  ;;  %s1651_s0 = inlined_call_operand.hbm [shape: f32[2,168], index: 0, kind: input, shape index: {}]   ;;  %s1652_s1 = inlined_call_operand.hbm [shape: bf16[168,256], index: 1, kind: input, shape index: {}]   ;;  %s1653_s2 = inlined_call_operand.vmem [shape: f32[1,256], index: 2, kind: input, shape index: {}]   ;;  %s1654_s3 = inlined_call_operand.hbm [shape: bf16[256,256], index: 3, kind: input, shape index: {}]   ;;  %s1655_s4 = inlined_call_operand.vmem [shape: f32[1,256], index: 4, kind: input, shape index: {}]   ;;  %s1656_s5 = inlined_call_operand.hbm [shape: bf16[256,256], index: 5, kind: input, shape index: {}]   ;;  %s1657_s6 = inlined_call_operand.vmem [shape: f32[1,256], index: 6, kind: input, shape index: {}]   ;;  %s1658_s7 = inlined_call_operand.hbm [shape: bf16[256,128], index: 7, kind: input, shape index: {}]   ;;  %s1659_s8 = inlined_call_operand.vmem [shape: f32[1,128], index: 8, kind: input, shape index: {}]   ;;  %s1660_s9 = inlined_call_operand.hbm [shape: bf16[2,128], index: 9, kind: output, shape index: {}]  }
   0x1   :  { %15 = vsyncpa [#allocation7], 0 }
   0x2   :  { %16 = vsyncpa [#allocation10], 0 }
   0x3   :  { %17 = vsyncpa [#allocation5], 0 }
   0x4   :  { %22 = vsyncadd [#allocation4], 192  ;;  %s1534_s30 = smov [#allocation6]  }
   0x5   :  { %s35_s10 = sshll.u32 %s1534_s30, 4  ;;  %s36_s10 = int_to_ptr.vmem [resolvable:$true] %s35_s10 }
   0x6   :  { %s1414_s11 = scalar_lea.vmem %s36_s10, 2688  ;;  %p1419_p1 = scmp.lt.s32.totalorder %s36_s10, %s36_s10 }
   0x7   :  { %p1415_p0 = scmp.ne.s32.totalorder %s36_s10, %s1414_s11  ;;  %p1420_p2 = scmp.lt.s32.totalorder %s1414_s11, %s1414_s11 }
   0x9   :  { %p1421_p3 = por %p1420_p2, %p1419_p1 }
   0xb   :  { %p1422_p4 = pnand %p1421_p3, %p1415_p0 }
   0xd   :  { %1425 = shalt.err (!%p1422_p4)
}
   0xe   :  { %s1535_s12 = smov 128   ;;  %s1536_s13 = smov 8  }
   0xf   :  { %41 = dma.hbm_to_vmem [thread:$0]  %s1652_s1, 2688, %s36_s10, [#allocation7], %s1535_s12, %s1535_s12, %s1536_s13  }
  0x10   :  { %s1537_s16 = smov [#allocation9]   ;;  %s1538_s18 = smov [#allocation3]  }
  0x11   :  { %s63_s17 = sshll.u32 %s1537_s16, 4  ;;  %s23_s19 = sshll.u32 %s1538_s18, 4  ;;  %s64_s17 = int_to_ptr.vmem [resolvable:$true] %s63_s17  ;;  %s24_s19 = int_to_ptr.vmem [resolvable:$true] %s23_s19 }
  0x12   :  { %s1434_s20 = scalar_lea.vmem %s64_s17, 4096  ;;  %p1439_p6 = scmp.lt.s32.totalorder %s64_s17, %s64_s17 }
  0x13   :  { %p1435_p5 = scmp.ne.s32.totalorder %s64_s17, %s1434_s20  ;;  %p1440_p7 = scmp.lt.s32.totalorder %s1434_s20, %s1434_s20 }
  0x15   :  { %p1441_p8 = por %p1440_p7, %p1439_p6 }
  0x17   :  { %p1442_p9 = pnand %p1441_p8, %p1435_p5 }
  0x19   :  { %1445 = shalt.err (!%p1442_p9)
}
  0x1a   :  { %69 = dma.hbm_to_vmem [thread:$0]  %s1656_s5, 4096, %s64_s17, [#allocation10], %s1535_s12, %s1535_s12, %s1536_s13  }
  0x1b   :  { %s1454_s1 = scalar_lea.vmem %s24_s19, 64  ;;  %s1458_s23 = scalar_lea.vmem %s24_s19, 256 }
  0x1c   :  { %p1455_p10 = scmp.ne.s32.totalorder %s24_s19, %s1454_s1  ;;  %p1459_p11 = scmp.lt.s32.totalorder %s24_s19, %s24_s19 }
  0x1d   :  { %p1460_p12 = scmp.lt.s32.totalorder %s1458_s23, %s1454_s1 }
  0x1f   :  { %p1461_p13 = por %p1460_p12, %p1459_p11 }
  0x21   :  { %p1462_p0 = pnand %p1461_p13, %p1455_p10 }
  0x23   :  { %1465 = shalt.err (!%p1462_p0)
}
  0x24   :  { %s1539_s24 = smov 64   ;;  %s1540_s25 = smov 4  }
  0x25   :  { %29 = dma.hbm_to_vmem [thread:$0]  %s1651_s0, 64, %s24_s19, [#allocation4], %s1539_s24, %s1539_s24, %s1540_s25  }
  0x26   :  { %s1541_s28 = smov [#allocation8]   ;;  %s1542_s30 = smov [#allocation11]  }
  0x27   :  { %s49_s29 = sshll.u32 %s1541_s28, 4  ;;  %s77_s5 = sshll.u32 %s1542_s30, 4  ;;  %s50_s29 = int_to_ptr.vmem [resolvable:$true] %s49_s29  ;;  %s78_s5 = int_to_ptr.vmem [resolvable:$true] %s77_s5 }
  0x28   :  { %s1474_s10 = scalar_lea.vmem %s50_s29, 4096  ;;  %p1479_p2 = scmp.lt.s32.totalorder %s50_s29, %s50_s29 }
  0x29   :  { %p1475_p1 = scmp.ne.s32.totalorder %s50_s29, %s1474_s10  ;;  %p1480_p3 = scmp.lt.s32.totalorder %s1474_s10, %s1474_s10 }
  0x2b   :  { %p1481_p4 = por %p1480_p3, %p1479_p2 }
  0x2d   :  { %p1482_p5 = pnand %p1481_p4, %p1475_p1 }
  0x2f   :  { %1485 = shalt.err (!%p1482_p5)
}
  0x30   :  { %55 = dma.hbm_to_vmem [thread:$0]  %s1654_s3, 4096, %s50_s29, [#allocation7], %s1535_s12, %s1535_s12, %s1536_s13  }
  0x31   :  { %s1494_s0 = scalar_lea.vmem %s78_s5, 2048  ;;  %p1499_p7 = scmp.lt.s32.totalorder %s78_s5, %s78_s5 }
  0x32   :  { %p1495_p6 = scmp.ne.s32.totalorder %s78_s5, %s1494_s0  ;;  %p1500_p8 = scmp.lt.s32.totalorder %s1494_s0, %s1494_s0 }
  0x34   :  { %p1501_p9 = por %p1500_p8, %p1499_p7 }
  0x36   :  { %p1502_p10 = pnand %p1501_p9, %p1495_p6 }
  0x38   :  { %1505 = shalt.err (!%p1502_p10)
}
  0x39   :  { %83 = dma.hbm_to_vmem [thread:$0]  %s1658_s7, 2048, %s78_s5, [#allocation10], %s1539_s24, %s1539_s24, %s1540_s25  }
  0x3a   :  { %1526 = dma.done.wait [#allocation4], 256  }
  0x3b   :  { %1527 = vsyncadd [#allocation4], 4294967040 }
  0x3c   :  { %1528 = dma.done.wait [#allocation7], 6784  }
  0x3d   :  { %1529 = vsyncadd [#allocation7], 4294960512 }
  0x3e   :  { %1530 = dma.done.wait [#allocation10], 6144  }
  0x3f   :  { %1531 = vsyncadd [#allocation10], 4294961152  ;;  %v1258_v0 = vld [vmem:[#allocation6 + $0x74] ss:$8 sps:$4 sm:$0xff]   ;;  %v1260_v1 = vld [vmem:[#allocation6 + $0x70] ss:$8 sps:$4 sm:$0xff]   ;;  %v115_v4 = vlaneseq }
  0x40   :  { %281 = vmatprep.subr.bf16.mxu0 %v1258_v0  ;;  %v1261_v2 = vld [vmem:[#allocation6 + $0x64] ss:$8 sps:$4 sm:$0xff]   ;;  %v1263_v3 = vld [vmem:[#allocation6 + $0x60] ss:$8 sps:$4 sm:$0xff]   ;;  %v1264_v5 = vld [vmem:[#allocation6 + $0x54] ss:$8 sps:$4 sm:$0xff]  }
  0x41   :  { %282 = vmatpush1.bf16.msra.mxu0 %v1260_v1  ;;  %v1266_v6 = vld [vmem:[#allocation6 + $0x50] ss:$8 sps:$4 sm:$0xff]   ;;  %v1621_v7 = vshrl.u32 %v115_v4, 7  ;;  %v1267_v8 = vld [vmem:[#allocation6 + $0x44] ss:$8 sps:$4 sm:$0xff]   ;;  %vm270_vm0 = vcmask 326656  }
  0x42   :  { %283 = vmatprep.subr.bf16.mxu0 %v1261_v2  ;;  %v1269_v9 = vld [vmem:[#allocation6 + $0x40] ss:$8 sps:$4 sm:$0xff]   ;;  %v1270_v10 = vld [vmem:[#allocation6 + $0x34] ss:$8 sps:$4 sm:$0xff]   ;;  %v1272_v11 = vld [vmem:[#allocation6 + $0x30] ss:$8 sps:$4 sm:$0xff]  }
  0x43   :  { %v1404_v12 = vld.sshfl [vmem:[#allocation3] sm:$0xff pattern:$0x76325410]  ;;  %v1273_v13 = vld [vmem:[#allocation6 + $0x24] ss:$8 sps:$4 sm:$0xff]   ;;  %vm274_vm1 = vcmask 1043456  }
  0x44   :  { %v1405_v14 = vld.sshfl [vmem:[#allocation3 + $0x8] sm:$0xff pattern:$0x76325410]  ;;  %v1295_v17 = vld [vmem:[#allocation8 + $0x64] ss:$8 sps:$4 sm:$0xff]   ;;  %v152_v26 = vld [vmem:[#allocation6 + $0xa0] sm:$0xff] }
  0x45   :  { %284 = vmatpush1.bf16.msra.mxu0 %v1263_v3  ;;  %v1292_v15 = vld [vmem:[#allocation8 + $0x74] ss:$8 sps:$4 sm:$0xff]   ;;  %v1294_v16 = vld [vmem:[#allocation8 + $0x70] ss:$8 sps:$4 sm:$0xff]   ;;  %v127_v19 = vcombine.high %v1404_v12, %v1405_v14  ;;  %v1297_v21 = vld [vmem:[#allocation8 + $0x60] ss:$8 sps:$4 sm:$0xff]   ;;  %v1118_v30 = vcombine.high %v152_v26, %v152_v26  ;;  %v1117_v31 = vcombine.low %v152_v26, %v152_v26  ;;  %v126_v43 = vcombine.low %v1404_v12, %v1405_v14 }
  0x46   :  { %285 = vmatprep.subr.bf16.mxu0 %v1264_v5  ;;  %545 = vmatprep.subr.bf16.mxu1 %v1292_v15  ;;  %v1275_v18 = vld [vmem:[#allocation6 + $0x20] ss:$8 sps:$4 sm:$0xff]   ;;  %v1276_v20 = vld [vmem:[#allocation6 + $0x14] ss:$8 sps:$4 sm:$0xff]   ;;  %v1278_v24 = vld [vmem:[#allocation6 + $0x10] ss:$8 sps:$4 sm:$0xff]  }
  0x47   :  { %546 = vmatpush1.bf16.msra.mxu1 %v1294_v16  ;;  %v131_v22 = vpack.c.bf16 %v127_v19, %v127_v19  ;;  %v1298_v23 = vld [vmem:[#allocation8 + $0x54] ss:$8 sps:$4 sm:$0xff]   ;;  %v1300_v27 = vld [vmem:[#allocation8 + $0x50] ss:$8 sps:$4 sm:$0xff]   ;;  %v1301_v28 = vld [vmem:[#allocation8 + $0x44] ss:$8 sps:$4 sm:$0xff]   ;;  %v130_v46 = vpack.c.bf16 %v126_v43, %v126_v43 }
  0x48   :  { %547 = vmatprep.subr.bf16.mxu1 %v1295_v17  ;;  %v1279_v25 = vld [vmem:[#allocation6 + $0x4] ss:$8 sps:$4 sm:$0xff]   ;;  %v1281_v29 = vld [vmem:[#allocation6] ss:$8 sps:$4 sm:$0xff]   ;;  %v276_v34 = vsel %vm274_vm1, %v1117_v31, 0  ;;  %v1630_v31 = vsub.s32 1, %v1621_v7 }
  0x49   :  { %286 = vmatpush1.bf16.msra.mxu0 %v1266_v6  ;;  %1120 = vmatprep.mubr.msk.bf16.mxu0 %vm270_vm0, %v131_v22  ;;  %v1303_v32 = vld [vmem:[#allocation8 + $0x40] ss:$8 sps:$4 sm:$0xff]   ;;  %v1304_v33 = vld [vmem:[#allocation8 + $0x34] ss:$8 sps:$4 sm:$0xff]   ;;  %v1306_v36 = vld [vmem:[#allocation8 + $0x30] ss:$8 sps:$4 sm:$0xff]  }
  0x4a   :  { %287 = vmatprep.subr.bf16.mxu0 %v1267_v8  ;;  %v1284_v35 = vld [vmem:[#allocation6 + $0x94] ss:$8 sps:$4 sm:$0xff]   ;;  %v1286_v37 = vld [vmem:[#allocation6 + $0x90] ss:$8 sps:$4 sm:$0xff]   ;;  %v1287_v39 = vld [vmem:[#allocation6 + $0x84] ss:$8 sps:$4 sm:$0xff]  }
  0x4b   :  { %548 = vmatpush1.bf16.msra.mxu1 %v1297_v21  ;;  %v1307_v38 = vld [vmem:[#allocation8 + $0x24] ss:$8 sps:$4 sm:$0xff]   ;;  %v1309_v40 = vld [vmem:[#allocation8 + $0x20] ss:$8 sps:$4 sm:$0xff]   ;;  %v1310_v41 = vld [vmem:[#allocation8 + $0x14] ss:$8 sps:$4 sm:$0xff]  }
  0x4c   :  { %549 = vmatprep.subr.bf16.mxu1 %v1298_v23  ;;  %v1289_v42 = vld [vmem:[#allocation6 + $0x80] ss:$8 sps:$4 sm:$0xff]   ;;  %v1313_v45 = vld [vmem:[#allocation8 + $0x4] ss:$8 sps:$4 sm:$0xff]   ;;  %v1316_v48 = vld [vmem:[#allocation8 + $0xf4] ss:$8 sps:$4 sm:$0xff]  }
  0x4d   :  { %288 = vmatpush1.bf16.msra.mxu0 %v1269_v9  ;;  %v1312_v44 = vld [vmem:[#allocation8 + $0x10] ss:$8 sps:$4 sm:$0xff]   ;;  %v1315_v47 = vld [vmem:[#allocation8] ss:$8 sps:$4 sm:$0xff]   ;;  %v1319_v50 = vld [vmem:[#allocation8 + $0xe4] ss:$8 sps:$4 sm:$0xff]  }
  0x4e   :  { %289 = vmatprep.subr.bf16.mxu0 %v1270_v10  ;;  %v1318_v49 = vld [vmem:[#allocation8 + $0xf0] ss:$8 sps:$4 sm:$0xff]   ;;  %v1321_v51 = vld [vmem:[#allocation8 + $0xe0] ss:$8 sps:$4 sm:$0xff]   ;;  %v1322_v52 = vld [vmem:[#allocation8 + $0xd4] ss:$8 sps:$4 sm:$0xff]  }
  0x4f   :  { %550 = vmatpush1.bf16.msra.mxu1 %v1300_v27  ;;  %v1324_v53 = vld [vmem:[#allocation8 + $0xd0] ss:$8 sps:$4 sm:$0xff]   ;;  %v1325_v54 = vld [vmem:[#allocation8 + $0xc4] ss:$8 sps:$4 sm:$0xff]   ;;  %v1327_v55 = vld [vmem:[#allocation8 + $0xc0] ss:$8 sps:$4 sm:$0xff]  }
  0x50   :  { %551 = vmatprep.subr.bf16.mxu1 %v1301_v28  ;;  %v1328_v56 = vld [vmem:[#allocation8 + $0xb4] ss:$8 sps:$4 sm:$0xff]   ;;  %v1330_v57 = vld [vmem:[#allocation8 + $0xb0] ss:$8 sps:$4 sm:$0xff]   ;;  %v1331_v58 = vld [vmem:[#allocation8 + $0xa4] ss:$8 sps:$4 sm:$0xff]  }
  0x51   :  { %290 = vmatpush1.bf16.msra.mxu0 %v1272_v11  ;;  %v1333_v59 = vld [vmem:[#allocation8 + $0xa0] ss:$8 sps:$4 sm:$0xff]   ;;  %v1334_v60 = vld [vmem:[#allocation8 + $0x94] ss:$8 sps:$4 sm:$0xff]   ;;  %v1336_v61 = vld [vmem:[#allocation8 + $0x90] ss:$8 sps:$4 sm:$0xff]  }
  0x52   :  { %291 = vmatprep.subr.bf16.mxu0 %v1273_v13  ;;  %v1337_v62 = vld [vmem:[#allocation8 + $0x84] ss:$8 sps:$4 sm:$0xff]   ;;  %v1339_v63 = vld [vmem:[#allocation8 + $0x80] ss:$8 sps:$4 sm:$0xff]   ;;  %v1340_v0 = vld [vmem:[#allocation9 + $0x70] ss:$8 sps:$4 sm:$0xff]  }
  0x53   :  { %552 = vmatpush1.bf16.msra.mxu1 %v1303_v32  ;;  %v1342_v1 = vld [vmem:[#allocation9 + $0x74] ss:$8 sps:$4 sm:$0xff]   ;;  %v1345_v2 = vld [vmem:[#allocation9 + $0x64] ss:$8 sps:$4 sm:$0xff]   ;;  %v1343_v3 = vld [vmem:[#allocation9 + $0x60] ss:$8 sps:$4 sm:$0xff]  }
  0x54   :  { %553 = vmatprep.subr.bf16.mxu1 %v1304_v33  ;;  %v1348_v4 = vld [vmem:[#allocation9 + $0x54] ss:$8 sps:$4 sm:$0xff]   ;;  %v1346_v5 = vld [vmem:[#allocation9 + $0x50] ss:$8 sps:$4 sm:$0xff]   ;;  %v1351_v6 = vld [vmem:[#allocation9 + $0x44] ss:$8 sps:$4 sm:$0xff]  }
  0x55   :  { %292 = vmatpush1.bf16.msra.mxu0 %v1275_v18  ;;  %v1349_v8 = vld [vmem:[#allocation9 + $0x40] ss:$8 sps:$4 sm:$0xff]   ;;  %v1354_v9 = vld [vmem:[#allocation9 + $0x34] ss:$8 sps:$4 sm:$0xff]   ;;  %v1352_v10 = vld [vmem:[#allocation9 + $0x30] ss:$8 sps:$4 sm:$0xff]  }
  0x56   :  { %293 = vmatprep.subr.bf16.mxu0 %v1276_v20  ;;  %v1357_v11 = vld [vmem:[#allocation9 + $0x24] ss:$8 sps:$4 sm:$0xff]   ;;  %v1355_v12 = vld [vmem:[#allocation9 + $0x20] ss:$8 sps:$4 sm:$0xff]   ;;  %v1360_v13 = vld [vmem:[#allocation9 + $0x14] ss:$8 sps:$4 sm:$0xff]  }
  0x57   :  { %554 = vmatpush1.bf16.msra.mxu1 %v1306_v36  ;;  %v1358_v14 = vld [vmem:[#allocation9 + $0x10] ss:$8 sps:$4 sm:$0xff]   ;;  %v1363_v15 = vld [vmem:[#allocation9 + $0x4] ss:$8 sps:$4 sm:$0xff]   ;;  %v1361_v16 = vld [vmem:[#allocation9] ss:$8 sps:$4 sm:$0xff]  }
  0x58   :  { %555 = vmatprep.subr.bf16.mxu1 %v1307_v38  ;;  %v1366_v17 = vld [vmem:[#allocation9 + $0xf4] ss:$8 sps:$4 sm:$0xff]   ;;  %v1364_v18 = vld [vmem:[#allocation9 + $0xf0] ss:$8 sps:$4 sm:$0xff]   ;;  %v1369_v19 = vld [vmem:[#allocation9 + $0xe4] ss:$8 sps:$4 sm:$0xff]  }
  0x59   :  { %294 = vmatpush1.bf16.msra.mxu0 %v1278_v24  ;;  %v1367_v20 = vld [vmem:[#allocation9 + $0xe0] ss:$8 sps:$4 sm:$0xff]   ;;  %v1372_v21 = vld [vmem:[#allocation9 + $0xd4] ss:$8 sps:$4 sm:$0xff]   ;;  %v1370_v22 = vld [vmem:[#allocation9 + $0xd0] ss:$8 sps:$4 sm:$0xff]  }
  0x5a   :  { %295 = vmatprep.subr.bf16.mxu0 %v1279_v25  ;;  %v1375_v23 = vld [vmem:[#allocation9 + $0xc4] ss:$8 sps:$4 sm:$0xff]   ;;  %v1373_v24 = vld [vmem:[#allocation9 + $0xc0] ss:$8 sps:$4 sm:$0xff]   ;;  %v1378_v25 = vld [vmem:[#allocation9 + $0xb4] ss:$8 sps:$4 sm:$0xff]  }
  0x5b   :  { %556 = vmatpush1.bf16.msra.mxu1 %v1309_v40  ;;  %v1376_v26 = vld [vmem:[#allocation9 + $0xb0] ss:$8 sps:$4 sm:$0xff]   ;;  %v1381_v27 = vld [vmem:[#allocation9 + $0xa4] ss:$8 sps:$4 sm:$0xff]   ;;  %v1379_v28 = vld [vmem:[#allocation9 + $0xa0] ss:$8 sps:$4 sm:$0xff]  }
  0x5c   :  { %557 = vmatprep.subr.bf16.mxu1 %v1310_v41 }
  0x5d   :  { %296 = vmatpush1.bf16.msra.mxu0 %v1281_v29  ;;  %v1624_v29 = vsub.s32 0, %v1621_v7 }
  0x5e   :  { %1119 = vmatprep.subr.msk.bf16.mxu0 %vm274_vm1, %v1118_v30  ;;  %v153_v30 = vld [vmem:[%s1653_s2] sm:$0x3] }
  0x5f   :  { %558 = vmatpush1.bf16.msra.mxu1 %v1312_v44  ;;  %v158_v32 = vrot.slane %v153_v30, %v1624_v29  ;;  %v162_v33 = vrot.slane %v153_v30, %v1630_v31  ;;  %v1384_v44 = vld [vmem:[#allocation9 + $0x94] ss:$8 sps:$4 sm:$0xff]  }
  0x60   :  { %559 = vmatprep.subr.bf16.mxu1 %v1313_v45  ;;  %v1382_v45 = vld [vmem:[#allocation9 + $0x90] ss:$8 sps:$4 sm:$0xff]  }
  0x61   :  { %308 = vmatpush2.bf16.msra.mxu0 %v276_v34 }
  0x62   :  { %309 = vmatprep.subr.bf16.mxu0 %v1284_v35 }
  0x63   :  { %560 = vmatpush1.bf16.msra.mxu1 %v1315_v47  ;;  %v1385_v47 = vld [vmem:[#allocation9 + $0x80] ss:$8 sps:$4 sm:$0xff]  }
  0x64   :  { %561 = vmatprep.subr.bf16.mxu1 %v1316_v48  ;;  %v1388_v48 = vld [vmem:[#allocation11 + $0x78] sm:$0xff]  }
  0x65   :  { %310 = vmatpush2.bf16.msra.mxu0 %v1286_v37 }
  0x66   :  { %311 = vmatprep.subr.bf16.mxu0 %v1287_v39 }
  0x67   :  { %562 = vmatpush2.bf16.msra.mxu1 %v1318_v49  ;;  %v1389_v49 = vld [vmem:[#allocation11 + $0x38] sm:$0xff]  }
  0x68   :  { %563 = vmatprep.subr.bf16.mxu1 %v1319_v50  ;;  %v1390_v50 = vld [vmem:[#allocation11 + $0x70] sm:$0xff]  }
  0x69   :  { %312 = vmatpush2.bf16.msra.mxu0 %v1289_v42 }
  0x6a   :  { %809 = vmatprep.subr.bf16.mxu0 %v1342_v1 }
  0x6b   :  { %564 = vmatpush2.bf16.msra.mxu1 %v1321_v51  ;;  %v1391_v51 = vld [vmem:[#allocation11 + $0x30] sm:$0xff]  }
  0x6c   :  { %314 = vmatmul.mubr.bf16.vlgmr.msra.gmra.mxu0 %v130_v46  ;;  %565 = vmatprep.subr.bf16.mxu1 %v1322_v52  ;;  %v1387_v46 = vld [vmem:[#allocation9 + $0x84] ss:$8 sps:$4 sm:$0xff]  }
  0x6d   :  { %810 = vmatpush1.bf16.msra.mxu0 %v1340_v0  ;;  %v1392_v52 = vld [vmem:[#allocation11 + $0x68] sm:$0xff]  }
  0x6e   :  { %811 = vmatprep.subr.bf16.mxu0 %v1345_v2 }
  0x6f   :  { %566 = vmatpush2.bf16.msra.mxu1 %v1324_v53  ;;  %v1393_v53 = vld [vmem:[#allocation11 + $0x28] sm:$0xff]  }
  0x70   :  { %567 = vmatprep.subr.bf16.mxu1 %v1325_v54  ;;  %v1394_v54 = vld [vmem:[#allocation11 + $0x60] sm:$0xff]  }
  0x71   :  { %812 = vmatpush1.bf16.msra.mxu0 %v1343_v3 }
  0x72   :  { %813 = vmatprep.subr.bf16.mxu0 %v1348_v4 }
  0x73   :  { %568 = vmatpush2.bf16.msra.mxu1 %v1327_v55  ;;  %v1395_v55 = vld [vmem:[#allocation11 + $0x20] sm:$0xff]  }
  0x74   :  { %569 = vmatprep.subr.bf16.mxu1 %v1328_v56  ;;  %v1396_v56 = vld [vmem:[#allocation11 + $0x58] sm:$0xff]  }
  0x75   :  { %814 = vmatpush1.bf16.msra.mxu0 %v1346_v5 }
  0x76   :  { %815 = vmatprep.subr.bf16.mxu0 %v1351_v6 }
  0x77   :  { %570 = vmatpush2.bf16.msra.mxu1 %v1330_v57  ;;  %v1397_v57 = vld [vmem:[#allocation11 + $0x18] sm:$0xff]  }
  0x78   :  { %571 = vmatprep.subr.bf16.mxu1 %v1331_v58  ;;  %v1398_v58 = vld [vmem:[#allocation11 + $0x50] sm:$0xff]  }
  0x79   :  { %816 = vmatpush1.bf16.msra.mxu0 %v1349_v8 }
  0x7a   :  { %817 = vmatprep.subr.bf16.mxu0 %v1354_v9 }
  0x7b   :  { %572 = vmatpush2.bf16.msra.mxu1 %v1333_v59  ;;  %v1399_v59 = vld [vmem:[#allocation11 + $0x10] sm:$0xff]  }
  0x7c   :  { %573 = vmatprep.subr.bf16.mxu1 %v1334_v60  ;;  %v366_v60 = vld [vmem:[%s1655_s4] sm:$0x3] }
  0x7d   :  { %818 = vmatpush1.bf16.msra.mxu0 %v1352_v10  ;;  %v1400_v10 = vld [vmem:[#allocation11 + $0x48] sm:$0xff]  }
  0x7e   :  { %819 = vmatprep.subr.bf16.mxu0 %v1357_v11  ;;  %v1401_v11 = vld [vmem:[#allocation11 + $0x8] sm:$0xff]  }
  0x7f   :  { %574 = vmatpush2.bf16.msra.mxu1 %v1336_v61  ;;  %v371_v61 = vrot.slane %v366_v60, %v1624_v29 }
  0x80   :  { %575 = vmatprep.subr.bf16.mxu1 %v1337_v62  ;;  %v375_v62 = vrot.slane %v366_v60, %v1630_v31 }
  0x81   :  { %820 = vmatpush1.bf16.msra.mxu0 %v1355_v12  ;;  %v1402_v12 = vld [vmem:[#allocation11 + $0x40] sm:$0xff]  }
  0x82   :  { %821 = vmatprep.subr.bf16.mxu0 %v1360_v13  ;;  %v1403_v13 = vld [vmem:[#allocation11] sm:$0xff]  }
  0x83   :  { %576 = vmatpush2.bf16.msra.mxu1 %v1339_v63 }
  0x84   :  { %1222 = vmatprep.subr.bf16.mxu1 %v1388_v48 }
  0x85   :  { %822 = vmatpush1.bf16.msra.mxu0 %v1358_v14  ;;  %v630_v14 = vld [vmem:[%s1657_s6] sm:$0x3] }
  0x86   :  { %823 = vmatprep.subr.bf16.mxu0 %v1363_v15  ;;  %v635_v15 = vrot.slane %v630_v14, %v1624_v29  ;;  %v1192_v29 = vld [vmem:[%s1659_s8] ss:$0 sm:$0xff] }
  0x89   :  { %824 = vmatpush1.bf16.msra.mxu0 %v1361_v16  ;;  %v639_v16 = vrot.slane %v630_v14, %v1630_v31 }
  0x8a   :  { %825 = vmatprep.subr.bf16.mxu0 %v1366_v17 }
  0x8d   :  { %826 = vmatpush2.bf16.msra.mxu0 %v1364_v18 }
  0x8e   :  { %827 = vmatprep.subr.bf16.mxu0 %v1369_v19 }
  0x91   :  { %828 = vmatpush2.bf16.msra.mxu0 %v1367_v20 }
  0x92   :  { %829 = vmatprep.subr.bf16.mxu0 %v1372_v21 }
  0x95   :  { %830 = vmatpush2.bf16.msra.mxu0 %v1370_v22 }
  0x96   :  { %831 = vmatprep.subr.bf16.mxu0 %v1375_v23 }
  0x99   :  { %832 = vmatpush2.bf16.msra.mxu0 %v1373_v24 }
  0x9a   :  { %833 = vmatprep.subr.bf16.mxu0 %v1378_v25 }
  0x9d   :  { %834 = vmatpush2.bf16.msra.mxu0 %v1376_v26 }
  0x9e   :  { %835 = vmatprep.subr.bf16.mxu0 %v1381_v27  ;;  %v1543_v27 = vmov 1966171168  }
  0xa1   :  { %836 = vmatpush2.bf16.msra.mxu0 %v1379_v28  ;;  %v1047_v28 = vunpack.c.l.s4 %v1543_v27 }
  0xa2   :  { %837 = vmatprep.subr.bf16.mxu0 %v1384_v44 }
  0xa5   :  { %838 = vmatpush2.bf16.msra.mxu0 %v1382_v45 }
  0xa6   :  { %839 = vmatprep.subr.bf16.mxu0 %v1387_v46 }
  0xa9   :  { %840 = vmatpush2.bf16.msra.mxu0 %v1385_v47 }
 0x12c   :  { %v315_v34 = vpop.f32.mrf.mxu0 }
 0x12d   :  { %v316_v35 = vadd.f32 %v315_v34, %v158_v32  ;;  %v1048_v32 = vunpack.c.0.s8 %v1047_v28 }
 0x12e   :  { %v317_v36 = vpop.f32.mrf.mxu0 }
 0x12f   :  { %v318_v37 = vadd.f32 %v317_v36, %v162_v33  ;;  %v322_v38 = vmax.f32 %v316_v35, 0.0  ;;  %v1051_v36 = vsub.s32 %v1048_v32, %v1621_v7 }
 0x130   :  { %v319_v39 = vpop.f32.mrf.mxu0 }
 0x131   :  { %v323_v40 = vmax.f32 %v318_v37, 0.0  ;;  %v1216_v43 = vpack.c.bf16 %v322_v38, %v322_v38 }
 0x132   :  { %v320_v41 = vpop.f32.mrf.mxu0 }
 0x133   :  { %v1217_v42 = vpack.c.bf16 %v323_v40, %v323_v40 }
 0x135   :  { %577 = vmatprep.mubr.bf16.mxu1 %v1217_v42 }
 0x136   :  { %578 = vmatmul.mubr.bf16.vlgmr.msra.gmra.mxu1 %v1216_v43 }
 0x137   :  { %1223 = vmatpush3.bf16.msra.mxu1 %v1389_v49 }
 0x138   :  { %1224 = vmatprep.subr.bf16.mxu1 %v1390_v50 }
 0x13b   :  { %1225 = vmatpush3.bf16.msra.mxu1 %v1391_v51 }
 0x13c   :  { %1226 = vmatprep.subr.bf16.mxu1 %v1392_v52 }
 0x13f   :  { %1227 = vmatpush3.bf16.msra.mxu1 %v1393_v53 }
 0x140   :  { %1228 = vmatprep.subr.bf16.mxu1 %v1394_v54 }
 0x143   :  { %1229 = vmatpush3.bf16.msra.mxu1 %v1395_v55 }
 0x144   :  { %1230 = vmatprep.subr.bf16.mxu1 %v1396_v56 }
 0x147   :  { %1231 = vmatpush3.bf16.msra.mxu1 %v1397_v57 }
 0x148   :  { %1232 = vmatprep.subr.bf16.mxu1 %v1398_v58 }
 0x14b   :  { %1233 = vmatpush3.bf16.msra.mxu1 %v1399_v59 }
 0x14c   :  { %1234 = vmatprep.subr.bf16.mxu1 %v1400_v10 }
 0x14f   :  { %1235 = vmatpush3.bf16.msra.mxu1 %v1401_v11 }
 0x150   :  { %1236 = vmatprep.subr.bf16.mxu1 %v1402_v12 }
 0x153   :  { %1237 = vmatpush3.bf16.msra.mxu1 %v1403_v13 }
 0x1f6   :  { %v579_v63 = vpop.f32.mrf.mxu1 }
 0x1f7   :  { %v580_v0 = vadd.f32 %v579_v63, %v371_v61 }
 0x1f8   :  { %v581_v1 = vpop.f32.mrf.mxu1 }
 0x1f9   :  { %v582_v2 = vadd.f32 %v581_v1, %v375_v62  ;;  %v586_v3 = vmax.f32 %v580_v0, 0.0 }
 0x1fa   :  { %v583_v4 = vpop.f32.mrf.mxu1 }
 0x1fb   :  { %v587_v5 = vmax.f32 %v582_v2, 0.0  ;;  %v1218_v9 = vpack.c.bf16 %v586_v3, %v586_v3 }
 0x1fc   :  { %v584_v6 = vpop.f32.mrf.mxu1 }
 0x1fd   :  { %v1219_v8 = vpack.c.bf16 %v587_v5, %v587_v5 }
 0x1ff   :  { %841 = vmatprep.mubr.bf16.mxu0 %v1219_v8 }
 0x200   :  { %842 = vmatmul.mubr.bf16.vlgmr.msra.gmra.mxu0 %v1218_v9 }
 0x2c0   :  { %v843_v17 = vpop.f32.mrf.mxu0 }
 0x2c1   :  { %v844_v18 = vadd.f32 %v843_v17, %v635_v15 }
 0x2c2   :  { %v845_v19 = vpop.f32.mrf.mxu0 }
 0x2c3   :  { %v846_v20 = vadd.f32 %v845_v19, %v639_v16  ;;  %v850_v21 = vmax.f32 %v844_v18, 0.0 }
 0x2c4   :  { %v847_v22 = vpop.f32.mrf.mxu0 }
 0x2c5   :  { %v851_v23 = vmax.f32 %v846_v20, 0.0  ;;  %v1220_v26 = vpack.c.bf16 %v850_v21, %v850_v21 }
 0x2c6   :  { %v848_v24 = vpop.f32.mrf.mxu0 }
 0x2c7   :  { %v1221_v25 = vpack.c.bf16 %v851_v23, %v851_v23 }
 0x2c9   :  { %1036 = vmatprep.mubr.bf16.mxu1 %v1221_v25 }
 0x2ca   :  { %1037 = vmatmul.mubr.bf16.vlgmr.msra.gmra.mxu1 %v1220_v26 }
 0x38a   :  { %v1238_v30 = vpop.f32.mrf.mxu1 }
 0x38c   :  { %v1239_v31 = vpop.f32.mrf.mxu1 }
 0x38d   :  { %v1240_v33 = vadd.f32 %v1239_v31, %v1238_v30 }
 0x38e   :  { %v1241_v34 = vpop.f32.mrf.mxu1 }
 0x38f   :  { %v1039_v35 = vadd.f32 %v1240_v33, %v1192_v29 }
 0x390   :  { %v1242_v37 = vpop.f32.mrf.mxu1 }
 0x391   :  { %v1044_v38 = vpack.c.bf16 %v1039_v35, %v1039_v35 }
 0x393   :  { %v1052_v39 = vrot.slane %v1044_v38, %v1051_v36 }
 0x395   :  { %v1053_v40 = vcombine.high %v1052_v39, %v1052_v39  ;;  %v1060_v41 = vrot.slane %v1052_v39, %v1051_v36  ;;  %1211 = vst.sshfl [vmem:[#allocation12] sm:$0x1 pattern:$0x73625140] %v1052_v39 }
 0x397   :  { %v1067_v42 = vrot.slane %v1053_v40, %v1051_v36  ;;  %v1068_v43 = vcombine.high %v1060_v41, %v1060_v41  ;;  %1212 = vst.sshfl [vmem:[#allocation12 + $0x1] sm:$0x1 pattern:$0x73625140] %v1053_v40 }
 0x399   :  { %v1069_v44 = vcombine.high %v1067_v42, %v1067_v42  ;;  %1076 = vst [vmem:[#allocation12 + $0x2] sm:$0x1] %v1068_v43 }
 0x39b   :  { %1077 = vst [vmem:[#allocation12 + $0x3] sm:$0x1] %v1069_v44 }
 0x39c   :  { %1082 = vsyncadd [#allocation5], 48  ;;  %s1544_s8 = smov [#allocation12]  }
 0x39d   :  { %s1083_s18 = sshll.u32 %s1544_s8, 4  ;;  %s1084_s18 = int_to_ptr.vmem [resolvable:$true] %s1083_s18 }
 0x39e   :  { %s1506_s19 = scalar_lea.vmem %s1084_s18, 16  ;;  %s1510_s20 = scalar_lea.vmem %s1084_s18, 64 }
 0x39f   :  { %p1507_p11 = scmp.ne.s32.totalorder %s1084_s18, %s1506_s19  ;;  %p1511_p12 = scmp.lt.s32.totalorder %s1084_s18, %s1084_s18 }
 0x3a0   :  { %p1512_p13 = scmp.lt.s32.totalorder %s1510_s20, %s1506_s19 }
 0x3a2   :  { %p1513_p0 = por %p1512_p13, %p1511_p12 }
 0x3a4   :  { %p1514_p1 = pnand %p1513_p0, %p1507_p11 }
 0x3a6   :  { %1517 = shalt.err (!%p1514_p1)
}
 0x3a7   :  { %s1545_s21 = smov 16   ;;  %s1546_s22 = smov 1  }
 0x3a8   :  { %1089 = dma.vmem_to_hbm [thread:$0]  %s1084_s18, 16, %s1660_s9, [#allocation5], %s1545_s21, %s1545_s21, %s1546_s22  }
 0x3a9   :  { %1532 = dma.done.wait [#allocation5], 64  }
 0x3aa   :  { %1533 = vsyncadd [#allocation5], 4294967232 }
 0x3ab   :  { %1093 = vsyncpa [#allocation4], 1 }
 0x3ac   :  { %1094 = vsyncpa [#allocation7], 1 }
 0x3ad   :  { %1095 = vsyncpa [#allocation10], 1 }
 0x3ae   :  { %1096 = vsyncpa [#allocation5], 1 }

// kernel: tpu_custom_call.1
= control target key start
LH: loop header
LB: loop body
LE: loop exit
PB: predicated region body
PF: predicated region fallthrough
CT: control target
= control target key end

     0   :  { %14 = vsyncpa [#allocation4], 0  ;;  %s1651_s0 = inlined_call_operand.hbm [shape: f32[2,168], index: 0, kind: input, shape index: {}]   ;;  %s1652_s1 = inlined_call_operand.hbm [shape: bf16[168,256], index: 1, kind: input, shape index: {}]   ;;  %s1653_s2 = inlined_call_operand.vmem [shape: f32[1,256], index: 2, kind: input, shape index: {}]   ;;  %s1654_s3 = inlined_call_operand.hbm [shape: bf16[256,256], index: 3, kind: input, shape index: {}]   ;;  %s1655_s4 = inlined_call_operand.vmem [shape: f32[1,256], index: 4, kind: input, shape index: {}]   ;;  %s1656_s5 = inlined_call_operand.hbm [shape: bf16[256,256], index: 5, kind: input, shape index: {}]   ;;  %s1657_s6 = inlined_call_operand.vmem [shape: f32[1,256], index: 6, kind: input, shape index: {}]   ;;  %s1658_s7 = inlined_call_operand.hbm [shape: bf16[256,128], index: 7, kind: input, shape index: {}]   ;;  %s1659_s8 = inlined_call_operand.vmem [shape: f32[1,128], index: 8, kind: input, shape index: {}]   ;;  %s1660_s9 = inlined_call_operand.hbm [shape: bf16[2,128], index: 9, kind: output, shape index: {}]  }
   0x1   :  { %15 = vsyncpa [#allocation7], 0 }
   0x2   :  { %16 = vsyncpa [#allocation10], 0 }
   0x3   :  { %17 = vsyncpa [#allocation5], 0 }
   0x4   :  { %22 = vsyncadd [#allocation4], 192  ;;  %s1534_s30 = smov [#allocation6]  }
   0x5   :  { %s35_s10 = sshll.u32 %s1534_s30, 4  ;;  %s36_s10 = int_to_ptr.vmem [resolvable:$true] %s35_s10 }
   0x6   :  { %s1414_s11 = scalar_lea.vmem %s36_s10, 2688  ;;  %p1419_p1 = scmp.lt.s32.totalorder %s36_s10, %s36_s10 }
   0x7   :  { %p1415_p0 = scmp.ne.s32.totalorder %s36_s10, %s1414_s11  ;;  %p1420_p2 = scmp.lt.s32.totalorder %s1414_s11, %s1414_s11 }
   0x9   :  { %p1421_p3 = por %p1420_p2, %p1419_p1 }
   0xb   :  { %p1422_p4 = pnand %p1421_p3, %p1415_p0 }
   0xd   :  { %1425 = shalt.err (!%p1422_p4)
}
   0xe   :  { %s1535_s12 = smov 128   ;;  %s1536_s13 = smov 8  }
   0xf   :  { %41 = dma.hbm_to_vmem [thread:$0]  %s1652_s1, 2688, %s36_s10, [#allocation7], %s1535_s12, %s1535_s12, %s1536_s13  }
  0x10   :  { %s1537_s16 = smov [#allocation9]   ;;  %s1538_s18 = smov [#allocation3]  }
  0x11   :  { %s63_s17 = sshll.u32 %s1537_s16, 4  ;;  %s23_s19 = sshll.u32 %s1538_s18, 4  ;;  %s64_s17 = int_to_ptr.vmem [resolvable:$true] %s63_s17  ;;  %s24_s19 = int_to_ptr.vmem [resolvable:$true] %s23_s19 }
  0x12   :  { %s1434_s20 = scalar_lea.vmem %s64_s17, 4096  ;;  %p1439_p6 = scmp.lt.s32.totalorder %s64_s17, %s64_s17 }
  0x13   :  { %p1435_p5 = scmp.ne.s32.totalorder %s64_s17, %s1434_s20  ;;  %p1440_p7 = scmp.lt.s32.totalorder %s1434_s20, %s1434_s20 }
  0x15   :  { %p1441_p8 = por %p1440_p7, %p1439_p6 }
  0x17   :  { %p1442_p9 = pnand %p1441_p8, %p1435_p5 }
  0x19   :  { %1445 = shalt.err (!%p1442_p9)
}
  0x1a   :  { %69 = dma.hbm_to_vmem [thread:$0]  %s1656_s5, 4096, %s64_s17, [#allocation10], %s1535_s12, %s1535_s12, %s1536_s13  }
  0x1b   :  { %s1454_s1 = scalar_lea.vmem %s24_s19, 64  ;;  %s1458_s23 = scalar_lea.vmem %s24_s19, 256 }
  0x1c   :  { %p1455_p10 = scmp.ne.s32.totalorder %s24_s19, %s1454_s1  ;;  %p1459_p11 = scmp.lt.s32.totalorder %s24_s19, %s24_s19 }
  0x1d   :  { %p1460_p12 = scmp.lt.s32.totalorder %s1458_s23, %s1454_s1 }
  0x1f   :  { %p1461_p13 = por %p1460_p12, %p1459_p11 }
  0x21   :  { %p1462_p0 = pnand %p1461_p13, %p1455_p10 }
  0x23   :  { %1465 = shalt.err (!%p1462_p0)
}
  0x24   :  { %s1539_s24 = smov 64   ;;  %s1540_s25 = smov 4  }
  0x25   :  { %29 = dma.hbm_to_vmem [thread:$0]  %s1651_s0, 64, %s24_s19, [#allocation4], %s1539_s24, %s1539_s24, %s1540_s25  }
  0x26   :  { %s1541_s28 = smov [#allocation8]   ;;  %s1542_s30 = smov [#allocation11]  }
  0x27   :  { %s49_s29 = sshll.u32 %s1541_s28, 4  ;;  %s77_s5 = sshll.u32 %s1542_s30, 4  ;;  %s50_s29 = int_to_ptr.vmem [resolvable:$true] %s49_s29  ;;  %s78_s5 = int_to_ptr.vmem [resolvable:$true] %s77_s5 }
  0x28   :  { %s1474_s10 = scalar_lea.vmem %s50_s29, 4096  ;;  %p1479_p2 = scmp.lt.s32.totalorder %s50_s29, %s50_s29 }
  0x29   :  { %p1475_p1 = scmp.ne.s32.totalorder %s50_s29, %s1474_s10  ;;  %p1480_p3 = scmp.lt.s32.totalorder %s1474_s10, %s1474_s10 }
  0x2b   :  { %p1481_p4 = por %p1480_p3, %p1479_p2 }
  0x2d   :  { %p1482_p5 = pnand %p1481_p4, %p1475_p1 }
  0x2f   :  { %1485 = shalt.err (!%p1482_p5)
}
  0x30   :  { %55 = dma.hbm_to_vmem [thread:$0]  %s1654_s3, 4096, %s50_s29, [#allocation7], %s1535_s12, %s1535_s12, %s1536_s13  }
  0x31   :  { %s1494_s0 = scalar_lea.vmem %s78_s5, 2048  ;;  %p1499_p7 = scmp.lt.s32.totalorder %s78_s5, %s78_s5 }
  0x32   :  { %p1495_p6 = scmp.ne.s32.totalorder %s78_s5, %s1494_s0  ;;  %p1500_p8 = scmp.lt.s32.totalorder %s1494_s0, %s1494_s0 }
  0x34   :  { %p1501_p9 = por %p1500_p8, %p1499_p7 }
  0x36   :  { %p1502_p10 = pnand %p1501_p9, %p1495_p6 }
  0x38   :  { %1505 = shalt.err (!%p1502_p10)
}
  0x39   :  { %83 = dma.hbm_to_vmem [thread:$0]  %s1658_s7, 2048, %s78_s5, [#allocation10], %s1539_s24, %s1539_s24, %s1540_s25  }
  0x3a   :  { %1526 = dma.done.wait [#allocation4], 256  }
  0x3b   :  { %1527 = vsyncadd [#allocation4], 4294967040 }
  0x3c   :  { %1528 = dma.done.wait [#allocation7], 6784  }
  0x3d   :  { %1529 = vsyncadd [#allocation7], 4294960512 }
  0x3e   :  { %1530 = dma.done.wait [#allocation10], 6144  }
  0x3f   :  { %1531 = vsyncadd [#allocation10], 4294961152  ;;  %v1258_v0 = vld [vmem:[#allocation6 + $0x74] ss:$8 sps:$4 sm:$0xff]   ;;  %v1260_v1 = vld [vmem:[#allocation6 + $0x70] ss:$8 sps:$4 sm:$0xff]   ;;  %v115_v4 = vlaneseq }
  0x40   :  { %281 = vmatprep.subr.bf16.mxu0 %v1258_v0  ;;  %v1261_v2 = vld [vmem:[#allocation6 + $0x64] ss:$8 sps:$4 sm:$0xff]   ;;  %v1263_v3 = vld [vmem:[#allocation6 + $0x60] ss:$8 sps:$4 sm:$0xff]   ;;  %v1264_v5 = vld [vmem:[#allocation6 + $0x54] ss:$8 sps:$4 sm:$0xff]  }
  0x41   :  { %282 = vmatpush1.bf16.msra.mxu0 %v1260_v1  ;;  %v1266_v6 = vld [vmem:[#allocation6 + $0x50] ss:$8 sps:$4 sm:$0xff]   ;;  %v1621_v7 = vshrl.u32 %v115_v4, 7  ;;  %v1267_v8 = vld [vmem:[#allocation6 + $0x44] ss:$8 sps:$4 sm:$0xff]   ;;  %vm270_vm0 = vcmask 326656  }
  0x42   :  { %283 = vmatprep.subr.bf16.mxu0 %v1261_v2  ;;  %v1269_v9 = vld [vmem:[#allocation6 + $0x40] ss:$8 sps:$4 sm:$0xff]   ;;  %v1270_v10 = vld [vmem:[#allocation6 + $0x34] ss:$8 sps:$4 sm:$0xff]   ;;  %v1272_v11 = vld [vmem:[#allocation6 + $0x30] ss:$8 sps:$4 sm:$0xff]  }
  0x43   :  { %v1404_v12 = vld.sshfl [vmem:[#allocation3] sm:$0xff pattern:$0x76325410]  ;;  %v1273_v13 = vld [vmem:[#allocation6 + $0x24] ss:$8 sps:$4 sm:$0xff]   ;;  %vm274_vm1 = vcmask 1043456  }
  0x44   :  { %v1405_v14 = vld.sshfl [vmem:[#allocation3 + $0x8] sm:$0xff pattern:$0x76325410]  ;;  %v1295_v17 = vld [vmem:[#allocation8 + $0x64] ss:$8 sps:$4 sm:$0xff]   ;;  %v152_v26 = vld [vmem:[#allocation6 + $0xa0] sm:$0xff] }
  0x45   :  { %284 = vmatpush1.bf16.msra.mxu0 %v1263_v3  ;;  %v1292_v15 = vld [vmem:[#allocation8 + $0x74] ss:$8 sps:$4 sm:$0xff]   ;;  %v1294_v16 = vld [vmem:[#allocation8 + $0x70] ss:$8 sps:$4 sm:$0xff]   ;;  %v127_v19 = vcombine.high %v1404_v12, %v1405_v14  ;;  %v1297_v21 = vld [vmem:[#allocation8 + $0x60] ss:$8 sps:$4 sm:$0xff]   ;;  %v1118_v30 = vcombine.high %v152_v26, %v152_v26  ;;  %v1117_v31 = vcombine.low %v152_v26, %v152_v26  ;;  %v126_v43 = vcombine.low %v1404_v12, %v1405_v14 }
  0x46   :  { %285 = vmatprep.subr.bf16.mxu0 %v1264_v5  ;;  %545 = vmatprep.subr.bf16.mxu1 %v1292_v15  ;;  %v1275_v18 = vld [vmem:[#allocation6 + $0x20] ss:$8 sps:$4 sm:$0xff]   ;;  %v1276_v20 = vld [vmem:[#allocation6 + $0x14] ss:$8 sps:$4 sm:$0xff]   ;;  %v1278_v24 = vld [vmem:[#allocation6 + $0x10] ss:$8 sps:$4 sm:$0xff]  }
  0x47   :  { %546 = vmatpush1.bf16.msra.mxu1 %v1294_v16  ;;  %v131_v22 = vpack.c.bf16 %v127_v19, %v127_v19  ;;  %v1298_v23 = vld [vmem:[#allocation8 + $0x54] ss:$8 sps:$4 sm:$0xff]   ;;  %v1300_v27 = vld [vmem:[#allocation8 + $0x50] ss:$8 sps:$4 sm:$0xff]   ;;  %v1301_v28 = vld [vmem:[#allocation8 + $0x44] ss:$8 sps:$4 sm:$0xff]   ;;  %v130_v46 = vpack.c.bf16 %v126_v43, %v126_v43 }
  0x48   :  { %547 = vmatprep.subr.bf16.mxu1 %v1295_v17  ;;  %v1279_v25 = vld [vmem:[#allocation6 + $0x4] ss:$8 sps:$4 sm:$0xff]   ;;  %v1281_v29 = vld [vmem:[#allocation6] ss:$8 sps:$4 sm:$0xff]   ;;  %v276_v34 = vsel %vm274_vm1, %v1117_v31, 0  ;;  %v1630_v31 = vsub.s32 1, %v1621_v7 }
  0x49   :  { %286 = vmatpush1.bf16.msra.mxu0 %v1266_v6  ;;  %1120 = vmatprep.mubr.msk.bf16.mxu0 %vm270_vm0, %v131_v22  ;;  %v1303_v32 = vld [vmem:[#allocation8 + $0x40] ss:$8 sps:$4 sm:$0xff]   ;;  %v1304_v33 = vld [vmem:[#allocation8 + $0x34] ss:$8 sps:$4 sm:$0xff]   ;;  %v1306_v36 = vld [vmem:[#allocation8 + $0x30] ss:$8 sps:$4 sm:$0xff]  }
  0x4a   :  { %287 = vmatprep.subr.bf16.mxu0 %v1267_v8  ;;  %v1284_v35 = vld [vmem:[#allocation6 + $0x94] ss:$8 sps:$4 sm:$0xff]   ;;  %v1286_v37 = vld [vmem:[#allocation6 + $0x90] ss:$8 sps:$4 sm:$0xff]   ;;  %v1287_v39 = vld [vmem:[#allocation6 + $0x84] ss:$8 sps:$4 sm:$0xff]  }
  0x4b   :  { %548 = vmatpush1.bf16.msra.mxu1 %v1297_v21  ;;  %v1307_v38 = vld [vmem:[#allocation8 + $0x24] ss:$8 sps:$4 sm:$0xff]   ;;  %v1309_v40 = vld [vmem:[#allocation8 + $0x20] ss:$8 sps:$4 sm:$0xff]   ;;  %v1310_v41 = vld [vmem:[#allocation8 + $0x14] ss:$8 sps:$4 sm:$0xff]  }
  0x4c   :  { %549 = vmatprep.subr.bf16.mxu1 %v1298_v23  ;;  %v1289_v42 = vld [vmem:[#allocation6 + $0x80] ss:$8 sps:$4 sm:$0xff]   ;;  %v1313_v45 = vld [vmem:[#allocation8 + $0x4] ss:$8 sps:$4 sm:$0xff]   ;;  %v1316_v48 = vld [vmem:[#allocation8 + $0xf4] ss:$8 sps:$4 sm:$0xff]  }
  0x4d   :  { %288 = vmatpush1.bf16.msra.mxu0 %v1269_v9  ;;  %v1312_v44 = vld [vmem:[#allocation8 + $0x10] ss:$8 sps:$4 sm:$0xff]   ;;  %v1315_v47 = vld [vmem:[#allocation8] ss:$8 sps:$4 sm:$0xff]   ;;  %v1319_v50 = vld [vmem:[#allocation8 + $0xe4] ss:$8 sps:$4 sm:$0xff]  }
  0x4e   :  { %289 = vmatprep.subr.bf16.mxu0 %v1270_v10  ;;  %v1318_v49 = vld [vmem:[#allocation8 + $0xf0] ss:$8 sps:$4 sm:$0xff]   ;;  %v1321_v51 = vld [vmem:[#allocation8 + $0xe0] ss:$8 sps:$4 sm:$0xff]   ;;  %v1322_v52 = vld [vmem:[#allocation8 + $0xd4] ss:$8 sps:$4 sm:$0xff]  }
  0x4f   :  { %550 = vmatpush1.bf16.msra.mxu1 %v1300_v27  ;;  %v1324_v53 = vld [vmem:[#allocation8 + $0xd0] ss:$8 sps:$4 sm:$0xff]   ;;  %v1325_v54 = vld [vmem:[#allocation8 + $0xc4] ss:$8 sps:$4 sm:$0xff]   ;;  %v1327_v55 = vld [vmem:[#allocation8 + $0xc0] ss:$8 sps:$4 sm:$0xff]  }
  0x50   :  { %551 = vmatprep.subr.bf16.mxu1 %v1301_v28  ;;  %v1328_v56 = vld [vmem:[#allocation8 + $0xb4] ss:$8 sps:$4 sm:$0xff]   ;;  %v1330_v57 = vld [vmem:[#allocation8 + $0xb0] ss:$8 sps:$4 sm:$0xff]   ;;  %v1331_v58 = vld [vmem:[#allocation8 + $0xa4] ss:$8 sps:$4 sm:$0xff]  }
  0x51   :  { %290 = vmatpush1.bf16.msra.mxu0 %v1272_v11  ;;  %v1333_v59 = vld [vmem:[#allocation8 + $0xa0] ss:$8 sps:$4 sm:$0xff]   ;;  %v1334_v60 = vld [vmem:[#allocation8 + $0x94] ss:$8 sps:$4 sm:$0xff]   ;;  %v1336_v61 = vld [vmem:[#allocation8 + $0x90] ss:$8 sps:$4 sm:$0xff]  }
  0x52   :  { %291 = vmatprep.subr.bf16.mxu0 %v1273_v13  ;;  %v1337_v62 = vld [vmem:[#allocation8 + $0x84] ss:$8 sps:$4 sm:$0xff]   ;;  %v1339_v63 = vld [vmem:[#allocation8 + $0x80] ss:$8 sps:$4 sm:$0xff]   ;;  %v1340_v0 = vld [vmem:[#allocation9 + $0x70] ss:$8 sps:$4 sm:$0xff]  }
  0x53   :  { %552 = vmatpush1.bf16.msra.mxu1 %v1303_v32  ;;  %v1342_v1 = vld [vmem:[#allocation9 + $0x74] ss:$8 sps:$4 sm:$0xff]   ;;  %v1345_v2 = vld [vmem:[#allocation9 + $0x64] ss:$8 sps:$4 sm:$0xff]   ;;  %v1343_v3 = vld [vmem:[#allocation9 + $0x60] ss:$8 sps:$4 sm:$0xff]  }
  0x54   :  { %553 = vmatprep.subr.bf16.mxu1 %v1304_v33  ;;  %v1348_v4 = vld [vmem:[#allocation9 + $0x54] ss:$8 sps:$4 sm:$0xff]   ;;  %v1346_v5 = vld [vmem:[#allocation9 + $0x50] ss:$8 sps:$4 sm:$0xff]   ;;  %v1351_v6 = vld [vmem:[#allocation9 + $0x44] ss:$8 sps:$4 sm:$0xff]  }
  0x55   :  { %292 = vmatpush1.bf16.msra.mxu0 %v1275_v18  ;;  %v1349_v8 = vld [vmem:[#allocation9 + $0x40] ss:$8 sps:$4 sm:$0xff]   ;;  %v1354_v9 = vld [vmem:[#allocation9 + $0x34] ss:$8 sps:$4 sm:$0xff]   ;;  %v1352_v10 = vld [vmem:[#allocation9 + $0x30] ss:$8 sps:$4 sm:$0xff]  }
  0x56   :  { %293 = vmatprep.subr.bf16.mxu0 %v1276_v20  ;;  %v1357_v11 = vld [vmem:[#allocation9 + $0x24] ss:$8 sps:$4 sm:$0xff]   ;;  %v1355_v12 = vld [vmem:[#allocation9 + $0x20] ss:$8 sps:$4 sm:$0xff]   ;;  %v1360_v13 = vld [vmem:[#allocation9 + $0x14] ss:$8 sps:$4 sm:$0xff]  }
  0x57   :  { %554 = vmatpush1.bf16.msra.mxu1 %v1306_v36  ;;  %v1358_v14 = vld [vmem:[#allocation9 + $0x10] ss:$8 sps:$4 sm:$0xff]   ;;  %v1363_v15 = vld [vmem:[#allocation9 + $0x4] ss:$8 sps:$4 sm:$0xff]   ;;  %v1361_v16 = vld [vmem:[#allocation9] ss:$8 sps:$4 sm:$0xff]  }
  0x58   :  { %555 = vmatprep.subr.bf16.mxu1 %v1307_v38  ;;  %v1366_v17 = vld [vmem:[#allocation9 + $0xf4] ss:$8 sps:$4 sm:$0xff]   ;;  %v1364_v18 = vld [vmem:[#allocation9 + $0xf0] ss:$8 sps:$4 sm:$0xff]   ;;  %v1369_v19 = vld [vmem:[#allocation9 + $0xe4] ss:$8 sps:$4 sm:$0xff]  }
  0x59   :  { %294 = vmatpush1.bf16.msra.mxu0 %v1278_v24  ;;  %v1367_v20 = vld [vmem:[#allocation9 + $0xe0] ss:$8 sps:$4 sm:$0xff]   ;;  %v1372_v21 = vld [vmem:[#allocation9 + $0xd4] ss:$8 sps:$4 sm:$0xff]   ;;  %v1370_v22 = vld [vmem:[#allocation9 + $0xd0] ss:$8 sps:$4 sm:$0xff]  }
  0x5a   :  { %295 = vmatprep.subr.bf16.mxu0 %v1279_v25  ;;  %v1375_v23 = vld [vmem:[#allocation9 + $0xc4] ss:$8 sps:$4 sm:$0xff]   ;;  %v1373_v24 = vld [vmem:[#allocation9 + $0xc0] ss:$8 sps:$4 sm:$0xff]   ;;  %v1378_v25 = vld [vmem:[#allocation9 + $0xb4] ss:$8 sps:$4 sm:$0xff]  }
  0x5b   :  { %556 = vmatpush1.bf16.msra.mxu1 %v1309_v40  ;;  %v1376_v26 = vld [vmem:[#allocation9 + $0xb0] ss:$8 sps:$4 sm:$0xff]   ;;  %v1381_v27 = vld [vmem:[#allocation9 + $0xa4] ss:$8 sps:$4 sm:$0xff]   ;;  %v1379_v28 = vld [vmem:[#allocation9 + $0xa0] ss:$8 sps:$4 sm:$0xff]  }
  0x5c   :  { %557 = vmatprep.subr.bf16.mxu1 %v1310_v41 }
  0x5d   :  { %296 = vmatpush1.bf16.msra.mxu0 %v1281_v29  ;;  %v1624_v29 = vsub.s32 0, %v1621_v7 }
  0x5e   :  { %1119 = vmatprep.subr.msk.bf16.mxu0 %vm274_vm1, %v1118_v30  ;;  %v153_v30 = vld [vmem:[%s1653_s2] sm:$0x3] }
  0x5f   :  { %558 = vmatpush1.bf16.msra.mxu1 %v1312_v44  ;;  %v158_v32 = vrot.slane %v153_v30, %v1624_v29  ;;  %v162_v33 = vrot.slane %v153_v30, %v1630_v31  ;;  %v1384_v44 = vld [vmem:[#allocation9 + $0x94] ss:$8 sps:$4 sm:$0xff]  }
  0x60   :  { %559 = vmatprep.subr.bf16.mxu1 %v1313_v45  ;;  %v1382_v45 = vld [vmem:[#allocation9 + $0x90] ss:$8 sps:$4 sm:$0xff]  }
  0x61   :  { %308 = vmatpush2.bf16.msra.mxu0 %v276_v34 }
  0x62   :  { %309 = vmatprep.subr.bf16.mxu0 %v1284_v35 }
  0x63   :  { %560 = vmatpush1.bf16.msra.mxu1 %v1315_v47  ;;  %v1385_v47 = vld [vmem:[#allocation9 + $0x80] ss:$8 sps:$4 sm:$0xff]  }
  0x64   :  { %561 = vmatprep.subr.bf16.mxu1 %v1316_v48  ;;  %v1388_v48 = vld [vmem:[#allocation11 + $0x78] sm:$0xff]  }
  0x65   :  { %310 = vmatpush2.bf16.msra.mxu0 %v1286_v37 }
  0x66   :  { %311 = vmatprep.subr.bf16.mxu0 %v1287_v39 }
  0x67   :  { %562 = vmatpush2.bf16.msra.mxu1 %v1318_v49  ;;  %v1389_v49 = vld [vmem:[#allocation11 + $0x38] sm:$0xff]  }
  0x68   :  { %563 = vmatprep.subr.bf16.mxu1 %v1319_v50  ;;  %v1390_v50 = vld [vmem:[#allocation11 + $0x70] sm:$0xff]  }
  0x69   :  { %312 = vmatpush2.bf16.msra.mxu0 %v1289_v42 }
  0x6a   :  { %809 = vmatprep.subr.bf16.mxu0 %v1342_v1 }
  0x6b   :  { %564 = vmatpush2.bf16.msra.mxu1 %v1321_v51  ;;  %v1391_v51 = vld [vmem:[#allocation11 + $0x30] sm:$0xff]  }
  0x6c   :  { %314 = vmatmul.mubr.bf16.vlgmr.msra.gmra.mxu0 %v130_v46  ;;  %565 = vmatprep.subr.bf16.mxu1 %v1322_v52  ;;  %v1387_v46 = vld [vmem:[#allocation9 + $0x84] ss:$8 sps:$4 sm:$0xff]  }
  0x6d   :  { %810 = vmatpush1.bf16.msra.mxu0 %v1340_v0  ;;  %v1392_v52 = vld [vmem:[#allocation11 + $0x68] sm:$0xff]  }
  0x6e   :  { %811 = vmatprep.subr.bf16.mxu0 %v1345_v2 }
  0x6f   :  { %566 = vmatpush2.bf16.msra.mxu1 %v1324_v53  ;;  %v1393_v53 = vld [vmem:[#allocation11 + $0x28] sm:$0xff]  }
  0x70   :  { %567 = vmatprep.subr.bf16.mxu1 %v1325_v54  ;;  %v1394_v54 = vld [vmem:[#allocation11 + $0x60] sm:$0xff]  }
  0x71   :  { %812 = vmatpush1.bf16.msra.mxu0 %v1343_v3 }
  0x72   :  { %813 = vmatprep.subr.bf16.mxu0 %v1348_v4 }
  0x73   :  { %568 = vmatpush2.bf16.msra.mxu1 %v1327_v55  ;;  %v1395_v55 = vld [vmem:[#allocation11 + $0x20] sm:$0xff]  }
  0x74   :  { %569 = vmatprep.subr.bf16.mxu1 %v1328_v56  ;;  %v1396_v56 = vld [vmem:[#allocation11 + $0x58] sm:$0xff]  }
  0x75   :  { %814 = vmatpush1.bf16.msra.mxu0 %v1346_v5 }
  0x76   :  { %815 = vmatprep.subr.bf16.mxu0 %v1351_v6 }
  0x77   :  { %570 = vmatpush2.bf16.msra.mxu1 %v1330_v57  ;;  %v1397_v57 = vld [vmem:[#allocation11 + $0x18] sm:$0xff]  }
  0x78   :  { %571 = vmatprep.subr.bf16.mxu1 %v1331_v58  ;;  %v1398_v58 = vld [vmem:[#allocation11 + $0x50] sm:$0xff]  }
  0x79   :  { %816 = vmatpush1.bf16.msra.mxu0 %v1349_v8 }
  0x7a   :  { %817 = vmatprep.subr.bf16.mxu0 %v1354_v9 }
  0x7b   :  { %572 = vmatpush2.bf16.msra.mxu1 %v1333_v59  ;;  %v1399_v59 = vld [vmem:[#allocation11 + $0x10] sm:$0xff]  }
  0x7c   :  { %573 = vmatprep.subr.bf16.mxu1 %v1334_v60  ;;  %v366_v60 = vld [vmem:[%s1655_s4] sm:$0x3] }
  0x7d   :  { %818 = vmatpush1.bf16.msra.mxu0 %v1352_v10  ;;  %v1400_v10 = vld [vmem:[#allocation11 + $0x48] sm:$0xff]  }
  0x7e   :  { %819 = vmatprep.subr.bf16.mxu0 %v1357_v11  ;;  %v1401_v11 = vld [vmem:[#allocation11 + $0x8] sm:$0xff]  }
  0x7f   :  { %574 = vmatpush2.bf16.msra.mxu1 %v1336_v61  ;;  %v371_v61 = vrot.slane %v366_v60, %v1624_v29 }
  0x80   :  { %575 = vmatprep.subr.bf16.mxu1 %v1337_v62  ;;  %v375_v62 = vrot.slane %v366_v60, %v1630_v31 }
  0x81   :  { %820 = vmatpush1.bf16.msra.mxu0 %v1355_v12  ;;  %v1402_v12 = vld [vmem:[#allocation11 + $0x40] sm:$0xff]  }
  0x82   :  { %821 = vmatprep.subr.bf16.mxu0 %v1360_v13  ;;  %v1403_v13 = vld [vmem:[#allocation11] sm:$0xff]  }
  0x83   :  { %576 = vmatpush2.bf16.msra.mxu1 %v1339_v63 }
  0x84   :  { %1222 = vmatprep.subr.bf16.mxu1 %v1388_v48 }
  0x85   :  { %822 = vmatpush1.bf16.msra.mxu0 %v1358_v14  ;;  %v630_v14 = vld [vmem:[%s1657_s6] sm:$0x3] }
  0x86   :  { %823 = vmatprep.subr.bf16.mxu0 %v1363_v15  ;;  %v635_v15 = vrot.slane %v630_v14, %v1624_v29  ;;  %v1192_v29 = vld [vmem:[%s1659_s8] ss:$0 sm:$0xff] }
  0x89   :  { %824 = vmatpush1.bf16.msra.mxu0 %v1361_v16  ;;  %v639_v16 = vrot.slane %v630_v14, %v1630_v31 }
  0x8a   :  { %825 = vmatprep.subr.bf16.mxu0 %v1366_v17 }
  0x8d   :  { %826 = vmatpush2.bf16.msra.mxu0 %v1364_v18 }
  0x8e   :  { %827 = vmatprep.subr.bf16.mxu0 %v1369_v19 }
  0x91   :  { %828 = vmatpush2.bf16.msra.mxu0 %v1367_v20 }
  0x92   :  { %829 = vmatprep.subr.bf16.mxu0 %v1372_v21 }
  0x95   :  { %830 = vmatpush2.bf16.msra.mxu0 %v1370_v22 }
  0x96   :  { %831 = vmatprep.subr.bf16.mxu0 %v1375_v23 }
  0x99   :  { %832 = vmatpush2.bf16.msra.mxu0 %v1373_v24 }
  0x9a   :  { %833 = vmatprep.subr.bf16.mxu0 %v1378_v25 }
  0x9d   :  { %834 = vmatpush2.bf16.msra.mxu0 %v1376_v26 }
  0x9e   :  { %835 = vmatprep.subr.bf16.mxu0 %v1381_v27  ;;  %v1543_v27 = vmov 1966171168  }
  0xa1   :  { %836 = vmatpush2.bf16.msra.mxu0 %v1379_v28  ;;  %v1047_v28 = vunpack.c.l.s4 %v1543_v27 }
  0xa2   :  { %837 = vmatprep.subr.bf16.mxu0 %v1384_v44 }
  0xa5   :  { %838 = vmatpush2.bf16.msra.mxu0 %v1382_v45 }
  0xa6   :  { %839 = vmatprep.subr.bf16.mxu0 %v1387_v46 }
  0xa9   :  { %840 = vmatpush2.bf16.msra.mxu0 %v1385_v47 }
 0x12c   :  { %v315_v34 = vpop.f32.mrf.mxu0 }
 0x12d   :  { %v316_v35 = vadd.f32 %v315_v34, %v158_v32  ;;  %v1048_v32 = vunpack.c.0.s8 %v1047_v28 }
 0x12e   :  { %v317_v36 = vpop.f32.mrf.mxu0 }
 0x12f   :  { %v318_v37 = vadd.f32 %v317_v36, %v162_v33  ;;  %v322_v38 = vmax.f32 %v316_v35, 0.0  ;;  %v1051_v36 = vsub.s32 %v1048_v32, %v1621_v7 }
 0x130   :  { %v319_v39 = vpop.f32.mrf.mxu0 }
 0x131   :  { %v323_v40 = vmax.f32 %v318_v37, 0.0  ;;  %v1216_v43 = vpack.c.bf16 %v322_v38, %v322_v38 }
 0x132   :  { %v320_v41 = vpop.f32.mrf.mxu0 }
 0x133   :  { %v1217_v42 = vpack.c.bf16 %v323_v40, %v323_v40 }
 0x135   :  { %577 = vmatprep.mubr.bf16.mxu1 %v1217_v42 }
 0x136   :  { %578 = vmatmul.mubr.bf16.vlgmr.msra.gmra.mxu1 %v1216_v43 }
 0x137   :  { %1223 = vmatpush3.bf16.msra.mxu1 %v1389_v49 }
 0x138   :  { %1224 = vmatprep.subr.bf16.mxu1 %v1390_v50 }
 0x13b   :  { %1225 = vmatpush3.bf16.msra.mxu1 %v1391_v51 }
 0x13c   :  { %1226 = vmatprep.subr.bf16.mxu1 %v1392_v52 }
 0x13f   :  { %1227 = vmatpush3.bf16.msra.mxu1 %v1393_v53 }
 0x140   :  { %1228 = vmatprep.subr.bf16.mxu1 %v1394_v54 }
 0x143   :  { %1229 = vmatpush3.bf16.msra.mxu1 %v1395_v55 }
 0x144   :  { %1230 = vmatprep.subr.bf16.mxu1 %v1396_v56 }
 0x147   :  { %1231 = vmatpush3.bf16.msra.mxu1 %v1397_v57 }
 0x148   :  { %1232 = vmatprep.subr.bf16.mxu1 %v1398_v58 }
 0x14b   :  { %1233 = vmatpush3.bf16.msra.mxu1 %v1399_v59 }
 0x14c   :  { %1234 = vmatprep.subr.bf16.mxu1 %v1400_v10 }
 0x14f   :  { %1235 = vmatpush3.bf16.msra.mxu1 %v1401_v11 }
 0x150   :  { %1236 = vmatprep.subr.bf16.mxu1 %v1402_v12 }
 0x153   :  { %1237 = vmatpush3.bf16.msra.mxu1 %v1403_v13 }
 0x1f6   :  { %v579_v63 = vpop.f32.mrf.mxu1 }
 0x1f7   :  { %v580_v0 = vadd.f32 %v579_v63, %v371_v61 }
 0x1f8   :  { %v581_v1 = vpop.f32.mrf.mxu1 }
 0x1f9   :  { %v582_v2 = vadd.f32 %v581_v1, %v375_v62  ;;  %v586_v3 = vmax.f32 %v580_v0, 0.0 }
 0x1fa   :  { %v583_v4 = vpop.f32.mrf.mxu1 }
 0x1fb   :  { %v587_v5 = vmax.f32 %v582_v2, 0.0  ;;  %v1218_v9 = vpack.c.bf16 %v586_v3, %v586_v3 }
 0x1fc   :  { %v584_v6 = vpop.f32.mrf.mxu1 }
 0x1fd   :  { %v1219_v8 = vpack.c.bf16 %v587_v5, %v587_v5 }
 0x1ff   :  { %841 = vmatprep.mubr.bf16.mxu0 %v1219_v8 }
 0x200   :  { %842 = vmatmul.mubr.bf16.vlgmr.msra.gmra.mxu0 %v1218_v9 }
 0x2c0   :  { %v843_v17 = vpop.f32.mrf.mxu0 }
 0x2c1   :  { %v844_v18 = vadd.f32 %v843_v17, %v635_v15 }
 0x2c2   :  { %v845_v19 = vpop.f32.mrf.mxu0 }
 0x2c3   :  { %v846_v20 = vadd.f32 %v845_v19, %v639_v16  ;;  %v850_v21 = vmax.f32 %v844_v18, 0.0 }
 0x2c4   :  { %v847_v22 = vpop.f32.mrf.mxu0 }
 0x2c5   :  { %v851_v23 = vmax.f32 %v846_v20, 0.0  ;;  %v1220_v26 = vpack.c.bf16 %v850_v21, %v850_v21 }
 0x2c6   :  { %v848_v24 = vpop.f32.mrf.mxu0 }
 0x2c7   :  { %v1221_v25 = vpack.c.bf16 %v851_v23, %v851_v23 }
 0x2c9   :  { %1036 = vmatprep.mubr.bf16.mxu1 %v1221_v25 }
 0x2ca   :  { %1037 = vmatmul.mubr.bf16.vlgmr.msra.gmra.mxu1 %v1220_v26 }
 0x38a   :  { %v1238_v30 = vpop.f32.mrf.mxu1 }
 0x38c   :  { %v1239_v31 = vpop.f32.mrf.mxu1 }
 0x38d   :  { %v1240_v33 = vadd.f32 %v1239_v31, %v1238_v30 }
 0x38e   :  { %v1241_v34 = vpop.f32.mrf.mxu1 }
 0x38f   :  { %v1039_v35 = vadd.f32 %v1240_v33, %v1192_v29 }
 0x390   :  { %v1242_v37 = vpop.f32.mrf.mxu1 }
 0x391   :  { %v1044_v38 = vpack.c.bf16 %v1039_v35, %v1039_v35 }
 0x393   :  { %v1052_v39 = vrot.slane %v1044_v38, %v1051_v36 }
 0x395   :  { %v1053_v40 = vcombine.high %v1052_v39, %v1052_v39  ;;  %v1060_v41 = vrot.slane %v1052_v39, %v1051_v36  ;;  %1211 = vst.sshfl [vmem:[#allocation12] sm:$0x1 pattern:$0x73625140] %v1052_v39 }
 0x397   :  { %v1067_v42 = vrot.slane %v1053_v40, %v1051_v36  ;;  %v1068_v43 = vcombine.high %v1060_v41, %v1060_v41  ;;  %1212 = vst.sshfl [vmem:[#allocation12 + $0x1] sm:$0x1 pattern:$0x73625140] %v1053_v40 }
 0x399   :  { %v1069_v44 = vcombine.high %v1067_v42, %v1067_v42  ;;  %1076 = vst [vmem:[#allocation12 + $0x2] sm:$0x1] %v1068_v43 }
 0x39b   :  { %1077 = vst [vmem:[#allocation12 + $0x3] sm:$0x1] %v1069_v44 }
 0x39c   :  { %1082 = vsyncadd [#allocation5], 48  ;;  %s1544_s8 = smov [#allocation12]  }
 0x39d   :  { %s1083_s18 = sshll.u32 %s1544_s8, 4  ;;  %s1084_s18 = int_to_ptr.vmem [resolvable:$true] %s1083_s18 }
 0x39e   :  { %s1506_s19 = scalar_lea.vmem %s1084_s18, 16  ;;  %s1510_s20 = scalar_lea.vmem %s1084_s18, 64 }
 0x39f   :  { %p1507_p11 = scmp.ne.s32.totalorder %s1084_s18, %s1506_s19  ;;  %p1511_p12 = scmp.lt.s32.totalorder %s1084_s18, %s1084_s18 }
 0x3a0   :  { %p1512_p13 = scmp.lt.s32.totalorder %s1510_s20, %s1506_s19 }
 0x3a2   :  { %p1513_p0 = por %p1512_p13, %p1511_p12 }
 0x3a4   :  { %p1514_p1 = pnand %p1513_p0, %p1507_p11 }
 0x3a6   :  { %1517 = shalt.err (!%p1514_p1)
}
 0x3a7   :  { %s1545_s21 = smov 16   ;;  %s1546_s22 = smov 1  }
 0x3a8   :  { %1089 = dma.vmem_to_hbm [thread:$0]  %s1084_s18, 16, %s1660_s9, [#allocation5], %s1545_s21, %s1545_s21, %s1546_s22  }
 0x3a9   :  { %1532 = dma.done.wait [#allocation5], 64  }
 0x3aa   :  { %1533 = vsyncadd [#allocation5], 4294967232 }
 0x3ab   :  { %1093 = vsyncpa [#allocation4], 1 }
 0x3ac   :  { %1094 = vsyncpa [#allocation7], 1 }
 0x3ad   :  { %1095 = vsyncpa [#allocation10], 1 }
 0x3ae   :  { %1096 = vsyncpa [#allocation5], 1 }

</bundles_post_ra>
